<compile_context>
chip_gen: v6e
topology: v6e:2x2x1
jax: 0.10.0
libtpu: 0.0.40
codegen_flags: <defaults>
</compile_context>

<pallas_src>
import jax
import jax.numpy as jnp
from jax.experimental import pallas as pl
from jax.experimental.pallas import tpu as pltpu

IN_FEATURES = 768
OUT_FEATURES = 256
MAX_TM = 1024  # row-tile cap: ~9 MiB f32 working set, safe on v5e/v6e/v7x


def linear_kernel(x_ref, wT_ref, b_ref, o_ref):
    # x_ref:  (TM, 768)   VMEM  (row tile of the flattened input)
    # wT_ref: (768, 256)  VMEM  (pre-transposed weight, resident across grid)
    # b_ref:  (1, 256)    VMEM  (bias, resident across grid)
    # o_ref:  (TM, 256)   VMEM
    acc = jnp.dot(x_ref[...], wT_ref[...], preferred_element_type=jnp.float32)
    o_ref[...] = (acc + b_ref[...].astype(jnp.float32)).astype(o_ref.dtype)


def prepare_linear_norm_params(weight, bias):
    """Hoist the per-call transpose: store weight as (768, 256), bias as (1, 256)."""
    assert weight.shape == (OUT_FEATURES, IN_FEATURES)
    assert bias.shape == (OUT_FEATURES,)
    return weight.T, bias.reshape(1, OUT_FEATURES)


def _choose_tm(m):
    # 256-aligned (full MXU passes on v6e/v7x, also 128-aligned for v5e),
    # capped at MAX_TM to stay well inside scoped VMEM on every generation.
    return min(MAX_TM, ((m + 255) // 256) * 256)


def linear_norm_forward(x, wT, b2d):
    """y = x @ W^T + b, matching torch.nn.Linear(768, 256) semantics.

    x:   (..., 768)
    wT:  (768, 256)  -- pre-transposed weight from prepare_linear_norm_params
    b2d: (1, 256)
    returns (..., 256) in x.dtype
    """
    orig_shape = x.shape
    assert orig_shape[-1] == IN_FEATURES
    x2d = x.reshape(-1, IN_FEATURES)
    M = x2d.shape[0]

    TM = _choose_tm(M)
    M_pad = pl.cdiv(M, TM) * TM
    if M_pad != M:
        x2d = jnp.pad(x2d, ((0, M_pad - M), (0, 0)))

    grid = (M_pad // TM,)

    # VMEM budget: x tile + out tile (double-buffered) + resident weight/bias,
    # with 2x headroom for compiler scratch.
    itemsize = jnp.dtype(x.dtype).itemsize
    tile_bytes = (
        2 * TM * IN_FEATURES * itemsize
        + 2 * TM * OUT_FEATURES * itemsize
        + IN_FEATURES * OUT_FEATURES * jnp.dtype(wT.dtype).itemsize
        + OUT_FEATURES * jnp.dtype(b2d.dtype).itemsize
    )
    vmem_limit = min(64 * 1024 * 1024, 2 * tile_bytes + (1 << 20))

    out = pl.pallas_call(
        linear_kernel,
        out_shape=jax.ShapeDtypeStruct((M_pad, OUT_FEATURES), x.dtype),
        grid_spec=pltpu.PrefetchScalarGridSpec(
            num_scalar_prefetch=0,
            grid=grid,
            in_specs=[
                pl.BlockSpec((TM, IN_FEATURES), lambda i: (i, 0)),
                pl.BlockSpec((IN_FEATURES, OUT_FEATURES), lambda i: (0, 0)),
                pl.BlockSpec((1, OUT_FEATURES), lambda i: (0, 0)),
            ],
            out_specs=pl.BlockSpec((TM, OUT_FEATURES), lambda i: (i, 0)),
        ),
        compiler_params=pltpu.CompilerParams(
            dimension_semantics=("parallel",),  # shard row tiles across TCs on v7x
            vmem_limit_bytes=int(vmem_limit),
        ),
    )(x2d, wT, b2d)

    if M_pad != M:
        out = out[:M]
    return out.reshape(*orig_shape[:-1], OUT_FEATURES)


if __name__ == "__main__":
    key = jax.random.PRNGKey(0)
    kx, kw, kb = jax.random.split(key, 3)

    # Deterministic parameter init (shapes from nn.Linear(768, 256)).
    bound = 1.0 / (IN_FEATURES ** 0.5)
    weight = jax.random.uniform(
        kw, (OUT_FEATURES, IN_FEATURES), jnp.float32, -bound, bound
    )
    bias = jax.random.uniform(kb, (OUT_FEATURES,), jnp.float32, -bound, bound)

    # One-time parameter prep (transpose hoisted out of the per-call path).
    wT, b2d = prepare_linear_norm_params(weight, bias)

    # Small input consistent with the forward: (batch=2, seq=8, 768).
    x = jax.random.normal(kx, (2, 8, IN_FEATURES), jnp.float32)

    y = linear_norm_forward(x, wT, b2d)
    jax.block_until_ready(y)

    # Sanity check against plain JAX reference.
    y_ref = x @ weight.T + bias
    assert y.shape == (2, 8, OUT_FEATURES)
    assert jnp.allclose(y, y_ref, atol=1e-4, rtol=1e-4)

    print("KERNEL_OK")
</pallas_src>

<mosaic_0001>
module attributes {stable_mosaic.version = 11 : i64} {
  func.func @linear_kernel(%arg0: i32, %arg1: memref<256x768xf32, #tpu.memory_space<vmem>>, %arg2: memref<768x256xf32, #tpu.memory_space<vmem>>, %arg3: memref<1x256xf32, #tpu.memory_space<vmem>>, %arg4: memref<256x256xf32, #tpu.memory_space<vmem>>) attributes {dimension_semantics = [#tpu.dimension_semantics<parallel>], iteration_bounds = array<i64: 1>, scalar_prefetch = 0 : i64, scratch_operands = 0 : i64, tpu.core_type = #tpu.core_type<tc>, window_params = [{transform_indices = @transform_0, window_bounds = array<i64: 256, 768>}, {pipeline_mode = #tpu.pipeline_mode<synchronous>, transform_indices = @transform_1, window_bounds = array<i64: 768, 256>}, {pipeline_mode = #tpu.pipeline_mode<synchronous>, transform_indices = @transform_2, window_bounds = array<i64: 1, 256>}, {transform_indices = @transform_3, window_bounds = array<i64: 256, 256>}]} {
    %c0 = arith.constant 0 : index
    %c0_0 = arith.constant 0 : index
    %0 = vector.load %arg1[%c0, %c0_0] : memref<256x768xf32, #tpu.memory_space<vmem>>, vector<256x768xf32>
    %c0_1 = arith.constant 0 : index
    %c0_2 = arith.constant 0 : index
    %1 = vector.load %arg2[%c0_1, %c0_2] : memref<768x256xf32, #tpu.memory_space<vmem>>, vector<768x256xf32>
    %cst = arith.constant dense<0.000000e+00> : vector<256x256xf32>
    %2 = tpu.matmul %0, %1, %cst {dimension_numbers = #tpu.dot_dimension_numbers<[1], [0], [0], [1], [0, 0, 1, 1], [], []>} : vector<256x768xf32>, vector<768x256xf32>, vector<256x256xf32> -> vector<256x256xf32>
    %c0_3 = arith.constant 0 : index
    %c0_4 = arith.constant 0 : index
    %3 = vector.load %arg3[%c0_3, %c0_4] : memref<1x256xf32, #tpu.memory_space<vmem>>, vector<1x256xf32>
    %4 = vector.broadcast %3 : vector<1x256xf32> to vector<256x256xf32>
    %5 = arith.addf %2, %4 : vector<256x256xf32>
    %c0_5 = arith.constant 0 : index
    %c0_6 = arith.constant 0 : index
    %6 = vector.load %arg4[%c0_5, %c0_6] : memref<256x256xf32, #tpu.memory_space<vmem>>, vector<256x256xf32>
    tpu.vector_store %arg4[%c0_5, %c0_6], %5 {strides = array<i32>} : memref<256x256xf32, #tpu.memory_space<vmem>>, vector<256x256xf32>,
    return
  }
  func.func @transform_0(%arg0: i32) -> (i32, i32) {
    %c0_i32 = arith.constant 0 : i32
    %c0_i32_0 = arith.constant 0 : i32
    return %arg0, %c0_i32 : i32, i32
  }
  func.func @transform_1(%arg0: i32) -> (i32, i32) {
    %c0_i32 = arith.constant 0 : i32
    %c0_i32_0 = arith.constant 0 : i32
    %c0_i32_1 = arith.constant 0 : i32
    return %c0_i32, %c0_i32_0 : i32, i32
  }
  func.func @transform_2(%arg0: i32) -> (i32, i32) {
    %c0_i32 = arith.constant 0 : i32
    %c0_i32_0 = arith.constant 0 : i32
    %c0_i32_1 = arith.constant 0 : i32
    return %c0_i32, %c0_i32_0 : i32, i32
  }
  func.func @transform_3(%arg0: i32) -> (i32, i32) {
    %c0_i32 = arith.constant 0 : i32
    %c0_i32_0 = arith.constant 0 : i32
    return %arg0, %c0_i32 : i32, i32
  }
}

</mosaic_0001>

<bundles_post_ra>
// kernel: tpu_custom_call.1
= control target key start
LH: loop header
LB: loop body
LE: loop exit
PB: predicated region body
PF: predicated region fallthrough
CT: control target
= control target key end

     0   :  { %8 = vsyncpa [#allocation3], 0  ;;  %s1734_s0 = inlined_call_operand.hbm [shape: f32[256,768], index: 0, kind: input, shape index: {}]   ;;  %s1735_s1 = inlined_call_operand.hbm [shape: f32[768,256], index: 1, kind: input, shape index: {}]   ;;  %s1736_s2 = inlined_call_operand.vmem [shape: f32[1,256], index: 2, kind: input, shape index: {}]   ;;  %s1737_s3 = inlined_call_operand.hbm [shape: f32[256,256], index: 3, kind: output, shape index: {}]  }
   0x1   :  { %9 = vsyncpa [#allocation6], 0 }
   0x2   :  { %10 = vsyncpa [#allocation4], 0  ;;  %s1429_s12 = smov [#allocation2]  }
   0x3   :  { %s16_s13 = sshll.u32 %s1429_s12, 4  ;;  %s17_s13 = int_to_ptr.vmem [resolvable:$true] %s16_s13 }
   0x4   :  { %s1371_s14 = scalar_lea.vmem %s17_s13, 24576  ;;  %p1376_p1 = scmp.lt.s32.totalorder %s17_s13, %s17_s13 }
   0x5   :  { %p1372_p0 = scmp.ne.s32.totalorder %s17_s13, %s1371_s14  ;;  %p1377_p2 = scmp.lt.s32.totalorder %s1371_s14, %s1371_s14 }
   0x7   :  { %p1378_p3 = por %p1377_p2, %p1376_p1 }
   0x9   :  { %p1379_p4 = pnand %p1378_p3, %p1372_p0 }
   0xb   :  { %1382 = shalt.err (!%p1379_p4)
}
   0xc   :  { %s1430_s15 = smov 768   ;;  %s1431_s16 = smov 48  }
   0xd   :  { %22 = dma.hbm_to_vmem [thread:$0]  %s1734_s0, 24576, %s17_s13, [#allocation3], %s1430_s15, %s1430_s15, %s1431_s16  }
   0xe   :  { %s1432_s19 = smov [#allocation5]  }
   0xf   :  { %s28_s20 = sshll.u32 %s1432_s19, 4  ;;  %s29_s20 = int_to_ptr.vmem [resolvable:$true] %s28_s20 }
  0x10   :  { %s1391_s21 = scalar_lea.vmem %s29_s20, 24576  ;;  %p1396_p6 = scmp.lt.s32.totalorder %s29_s20, %s29_s20 }
  0x11   :  { %p1392_p5 = scmp.ne.s32.totalorder %s29_s20, %s1391_s21  ;;  %p1397_p7 = scmp.lt.s32.totalorder %s1391_s21, %s1391_s21 }
  0x13   :  { %p1398_p8 = por %p1397_p7, %p1396_p6 }
  0x15   :  { %p1399_p9 = pnand %p1398_p8, %p1392_p5 }
  0x17   :  { %1402 = shalt.err (!%p1399_p9)
}
  0x18   :  { %s1433_s22 = smov 256   ;;  %s1434_s23 = smov 16  }
  0x19   :  { %34 = dma.hbm_to_vmem [thread:$0]  %s1735_s1, 24576, %s29_s20, [#allocation6], %s1433_s22, %s1433_s22, %s1434_s23  }
  0x1a   :  { %1423 = dma.done.wait [#allocation3], 24576  }
  0x1b   :  { %1424 = vsyncadd [#allocation3], 4294942720 }
  0x1c   :  { %1425 = dma.done.wait [#allocation6], 24576  }
  0x1d   :  { %1426 = vsyncadd [#allocation6], 4294942720  ;;  %v266_v0 = vld [vmem:[#allocation5 + $0xf8] sm:$0xff]  ;;  %v265_v1 = vld [vmem:[#allocation5 + $0xf0] sm:$0xff] }
  0x1e   :  { %v264_v2 = vld [vmem:[#allocation5 + $0xe8] sm:$0xff]  ;;  %1292 = vmatprep.subr.mxu1 %v266_v0  ;;  %439 = vmatprep.subr.mxu0 %v266_v0  ;;  %v263_v3 = vld [vmem:[#allocation5 + $0xe0] sm:$0xff]  ;;  %v262_v4 = vld [vmem:[#allocation5 + $0xd8] sm:$0xff] }
  0x1f   :  { %1324 = vmatpush1.msra.mxu1 %v265_v1  ;;  %440 = vmatpush1.msra.mxu0 %v265_v1  ;;  %v261_v5 = vld [vmem:[#allocation5 + $0xd0] sm:$0xff]  ;;  %v260_v6 = vld [vmem:[#allocation5 + $0xc8] sm:$0xff]  ;;  %v259_v7 = vld [vmem:[#allocation5 + $0xc0] sm:$0xff] }
  0x20   :  { %1293 = vmatprep.subr.mxu1 %v264_v2  ;;  %441 = vmatprep.subr.mxu0 %v264_v2  ;;  %v258_v8 = vld [vmem:[#allocation5 + $0xb8] sm:$0xff]  ;;  %v257_v9 = vld [vmem:[#allocation5 + $0xb0] sm:$0xff]  ;;  %v256_v10 = vld [vmem:[#allocation5 + $0xa8] sm:$0xff] }
  0x21   :  { %1325 = vmatpush1.msra.mxu1 %v263_v3  ;;  %442 = vmatpush1.msra.mxu0 %v263_v3  ;;  %v255_v11 = vld [vmem:[#allocation5 + $0xa0] sm:$0xff]  ;;  %v254_v12 = vld [vmem:[#allocation5 + $0x98] sm:$0xff]  ;;  %v253_v13 = vld [vmem:[#allocation5 + $0x90] sm:$0xff] }
  0x22   :  { %1294 = vmatprep.subr.mxu1 %v262_v4  ;;  %443 = vmatprep.subr.mxu0 %v262_v4  ;;  %v252_v14 = vld [vmem:[#allocation5 + $0x88] sm:$0xff]  ;;  %v251_v15 = vld [vmem:[#allocation5 + $0x80] sm:$0xff]  ;;  %v250_v16 = vld [vmem:[#allocation5 + $0x78] sm:$0xff] }
  0x23   :  { %1326 = vmatpush1.msra.mxu1 %v261_v5  ;;  %444 = vmatpush1.msra.mxu0 %v261_v5  ;;  %v249_v17 = vld [vmem:[#allocation5 + $0x70] sm:$0xff]  ;;  %v248_v18 = vld [vmem:[#allocation5 + $0x68] sm:$0xff]  ;;  %v247_v19 = vld [vmem:[#allocation5 + $0x60] sm:$0xff] }
  0x24   :  { %1295 = vmatprep.subr.mxu1 %v260_v6  ;;  %445 = vmatprep.subr.mxu0 %v260_v6  ;;  %v246_v20 = vld [vmem:[#allocation5 + $0x58] sm:$0xff]  ;;  %v245_v21 = vld [vmem:[#allocation5 + $0x50] sm:$0xff]  ;;  %v244_v22 = vld [vmem:[#allocation5 + $0x48] sm:$0xff] }
  0x25   :  { %1327 = vmatpush1.msra.mxu1 %v259_v7  ;;  %446 = vmatpush1.msra.mxu0 %v259_v7  ;;  %v243_v23 = vld [vmem:[#allocation5 + $0x40] sm:$0xff]  ;;  %v242_v24 = vld [vmem:[#allocation5 + $0x38] sm:$0xff]  ;;  %v241_v25 = vld [vmem:[#allocation5 + $0x30] sm:$0xff] }
  0x26   :  { %1296 = vmatprep.subr.mxu1 %v258_v8  ;;  %447 = vmatprep.subr.mxu0 %v258_v8  ;;  %v240_v26 = vld [vmem:[#allocation5 + $0x28] sm:$0xff]  ;;  %v239_v27 = vld [vmem:[#allocation5 + $0x20] sm:$0xff]  ;;  %v238_v28 = vld [vmem:[#allocation5 + $0x18] sm:$0xff] }
  0x27   :  { %1328 = vmatpush1.msra.mxu1 %v257_v9  ;;  %448 = vmatpush1.msra.mxu0 %v257_v9  ;;  %v237_v29 = vld [vmem:[#allocation5 + $0x10] sm:$0xff]  ;;  %v236_v30 = vld [vmem:[#allocation5 + $0x8] sm:$0xff]  ;;  %v235_v31 = vld [vmem:[#allocation5] sm:$0xff] }
  0x28   :  { %1297 = vmatprep.subr.mxu1 %v256_v10  ;;  %449 = vmatprep.subr.mxu0 %v256_v10  ;;  %v298_v32 = vld [vmem:[#allocation5 + $0x1f8] sm:$0xff]  ;;  %v297_v33 = vld [vmem:[#allocation5 + $0x1f0] sm:$0xff]  ;;  %v296_v34 = vld [vmem:[#allocation5 + $0x1e8] sm:$0xff] }
  0x29   :  { %1329 = vmatpush1.msra.mxu1 %v255_v11  ;;  %450 = vmatpush1.msra.mxu0 %v255_v11  ;;  %v295_v35 = vld [vmem:[#allocation5 + $0x1e0] sm:$0xff]  ;;  %v294_v36 = vld [vmem:[#allocation5 + $0x1d8] sm:$0xff]  ;;  %v293_v37 = vld [vmem:[#allocation5 + $0x1d0] sm:$0xff] }
  0x2a   :  { %1298 = vmatprep.subr.mxu1 %v254_v12  ;;  %451 = vmatprep.subr.mxu0 %v254_v12  ;;  %v292_v38 = vld [vmem:[#allocation5 + $0x1c8] sm:$0xff]  ;;  %v291_v39 = vld [vmem:[#allocation5 + $0x1c0] sm:$0xff]  ;;  %v290_v40 = vld [vmem:[#allocation5 + $0x1b8] sm:$0xff] }
  0x2b   :  { %1330 = vmatpush1.msra.mxu1 %v253_v13  ;;  %452 = vmatpush1.msra.mxu0 %v253_v13  ;;  %v289_v41 = vld [vmem:[#allocation5 + $0x1b0] sm:$0xff]  ;;  %v288_v42 = vld [vmem:[#allocation5 + $0x1a8] sm:$0xff]  ;;  %v287_v43 = vld [vmem:[#allocation5 + $0x1a0] sm:$0xff] }
  0x2c   :  { %1299 = vmatprep.subr.mxu1 %v252_v14  ;;  %453 = vmatprep.subr.mxu0 %v252_v14  ;;  %v286_v44 = vld [vmem:[#allocation5 + $0x198] sm:$0xff]  ;;  %v285_v45 = vld [vmem:[#allocation5 + $0x190] sm:$0xff]  ;;  %v284_v46 = vld [vmem:[#allocation5 + $0x188] sm:$0xff] }
  0x2d   :  { %1331 = vmatpush1.msra.mxu1 %v251_v15  ;;  %454 = vmatpush1.msra.mxu0 %v251_v15  ;;  %v283_v47 = vld [vmem:[#allocation5 + $0x180] sm:$0xff]  ;;  %v282_v48 = vld [vmem:[#allocation5 + $0x178] sm:$0xff]  ;;  %v281_v49 = vld [vmem:[#allocation5 + $0x170] sm:$0xff] }
  0x2e   :  { %1300 = vmatprep.subr.mxu1 %v250_v16  ;;  %455 = vmatprep.subr.mxu0 %v250_v16  ;;  %v280_v50 = vld [vmem:[#allocation5 + $0x168] sm:$0xff]  ;;  %v279_v51 = vld [vmem:[#allocation5 + $0x160] sm:$0xff]  ;;  %v278_v52 = vld [vmem:[#allocation5 + $0x158] sm:$0xff] }
  0x2f   :  { %1332 = vmatpush1.msra.mxu1 %v249_v17  ;;  %456 = vmatpush1.msra.mxu0 %v249_v17  ;;  %v277_v53 = vld [vmem:[#allocation5 + $0x150] sm:$0xff]  ;;  %v276_v54 = vld [vmem:[#allocation5 + $0x148] sm:$0xff]  ;;  %v275_v55 = vld [vmem:[#allocation5 + $0x140] sm:$0xff] }
  0x30   :  { %1301 = vmatprep.subr.mxu1 %v248_v18  ;;  %457 = vmatprep.subr.mxu0 %v248_v18  ;;  %v274_v56 = vld [vmem:[#allocation5 + $0x138] sm:$0xff]  ;;  %v273_v57 = vld [vmem:[#allocation5 + $0x130] sm:$0xff]  ;;  %v272_v58 = vld [vmem:[#allocation5 + $0x128] sm:$0xff] }
  0x31   :  { %1333 = vmatpush1.msra.mxu1 %v247_v19  ;;  %458 = vmatpush1.msra.mxu0 %v247_v19  ;;  %v271_v59 = vld [vmem:[#allocation5 + $0x120] sm:$0xff]  ;;  %v270_v60 = vld [vmem:[#allocation5 + $0x118] sm:$0xff]  ;;  %v269_v61 = vld [vmem:[#allocation5 + $0x110] sm:$0xff] }
  0x32   :  { %1302 = vmatprep.subr.mxu1 %v246_v20  ;;  %459 = vmatprep.subr.mxu0 %v246_v20  ;;  %v268_v62 = vld [vmem:[#allocation5 + $0x108] sm:$0xff]  ;;  %v267_v63 = vld [vmem:[#allocation5 + $0x100] sm:$0xff]  ;;  %v330_v3 = vld [vmem:[#allocation5 + $0x2f8] sm:$0xff] }
  0x33   :  { %1334 = vmatpush1.msra.mxu1 %v245_v21  ;;  %460 = vmatpush1.msra.mxu0 %v245_v21  ;;  %v140_v0 = vld [vmem:[#allocation2 + $0x308] sm:$0xff]  ;;  %v139_v2 = vld [vmem:[#allocation2 + $0x300] sm:$0xff]  ;;  %v329_v5 = vld [vmem:[#allocation5 + $0x2f0] sm:$0xff] }
  0x34   :  { %1303 = vmatprep.subr.mxu1 %v244_v22  ;;  %461 = vmatprep.subr.mxu0 %v244_v22  ;;  %v44_v1 = vld [vmem:[#allocation2 + $0x8] sm:$0xff]  ;;  %v43_v4 = vld [vmem:[#allocation2] sm:$0xff]  ;;  %v394_v6 = vld [vmem:[#allocation5 + $0x4f8] sm:$0xff] }
  0x35   :  { %1335 = vmatpush1.msra.mxu1 %v243_v23  ;;  %462 = vmatpush1.msra.mxu0 %v243_v23  ;;  %v328_v7 = vld [vmem:[#allocation5 + $0x2e8] sm:$0xff]  ;;  %v393_v8 = vld [vmem:[#allocation5 + $0x4f0] sm:$0xff]  ;;  %v146_v9 = vld [vmem:[#allocation2 + $0x338] sm:$0xff] }
  0x36   :  { %1304 = vmatprep.subr.mxu1 %v242_v24  ;;  %463 = vmatprep.subr.mxu0 %v242_v24  ;;  %v327_v10 = vld [vmem:[#allocation5 + $0x2e0] sm:$0xff]  ;;  %v392_v11 = vld [vmem:[#allocation5 + $0x4e8] sm:$0xff]  ;;  %v50_v12 = vld [vmem:[#allocation2 + $0x38] sm:$0xff] }
  0x37   :  { %1336 = vmatpush1.msra.mxu1 %v241_v25  ;;  %464 = vmatpush1.msra.mxu0 %v241_v25  ;;  %v145_v13 = vld [vmem:[#allocation2 + $0x330] sm:$0xff]  ;;  %v326_v14 = vld [vmem:[#allocation5 + $0x2d8] sm:$0xff]  ;;  %v391_v15 = vld [vmem:[#allocation5 + $0x4e0] sm:$0xff] }
  0x38   :  { %1305 = vmatprep.subr.mxu1 %v240_v26  ;;  %465 = vmatprep.subr.mxu0 %v240_v26  ;;  %v49_v16 = vld [vmem:[#allocation2 + $0x30] sm:$0xff]  ;;  %v390_v18 = vld [vmem:[#allocation5 + $0x4d8] sm:$0xff]  ;;  %v324_v19 = vld [vmem:[#allocation5 + $0x2c8] sm:$0xff] }
  0x39   :  { %1337 = vmatpush1.msra.mxu1 %v239_v27  ;;  %466 = vmatpush1.msra.mxu0 %v239_v27  ;;  %v325_v17 = vld [vmem:[#allocation5 + $0x2d0] sm:$0xff]  ;;  %v152_v21 = vld [vmem:[#allocation2 + $0x368] sm:$0xff]  ;;  %v323_v22 = vld [vmem:[#allocation5 + $0x2c0] sm:$0xff] }
  0x3a   :  { %1306 = vmatprep.subr.mxu1 %v238_v28  ;;  %467 = vmatprep.subr.mxu0 %v238_v28  ;;  %v389_v20 = vld [vmem:[#allocation5 + $0x4d0] sm:$0xff]  ;;  %v388_v23 = vld [vmem:[#allocation5 + $0x4c8] sm:$0xff]  ;;  %v151_v25 = vld [vmem:[#allocation2 + $0x360] sm:$0xff] }
  0x3b   :  { %1338 = vmatpush1.msra.mxu1 %v237_v29  ;;  %468 = vmatpush1.msra.mxu0 %v237_v29  ;;  %v56_v24 = vld [vmem:[#allocation2 + $0x68] sm:$0xff]  ;;  %v322_v26 = vld [vmem:[#allocation5 + $0x2b8] sm:$0xff]  ;;  %v387_v27 = vld [vmem:[#allocation5 + $0x4c0] sm:$0xff] }
  0x3c   :  { %1307 = vmatprep.subr.mxu1 %v236_v30  ;;  %469 = vmatprep.subr.mxu0 %v236_v30  ;;  %v55_v28 = vld [vmem:[#allocation2 + $0x60] sm:$0xff]  ;;  %v321_v29 = vld [vmem:[#allocation5 + $0x2b0] sm:$0xff]  ;;  %v386_v30 = vld [vmem:[#allocation5 + $0x4b8] sm:$0xff] }
  0x3d   :  { %1339 = vmatpush1.msra.mxu1 %v235_v31  ;;  %470 = vmatpush1.msra.mxu0 %v235_v31  ;;  %v320_v31 = vld [vmem:[#allocation5 + $0x2a8] sm:$0xff] }
  0x3e   :  { %1308 = vmatprep.subr.mxu1 %v298_v32  ;;  %471 = vmatprep.subr.mxu0 %v298_v32  ;;  %v385_v32 = vld [vmem:[#allocation5 + $0x4b0] sm:$0xff] }
  0x3f   :  { %1340 = vmatpush2.msra.mxu1 %v297_v33  ;;  %472 = vmatpush2.msra.mxu0 %v297_v33  ;;  %v158_v33 = vld [vmem:[#allocation2 + $0x398] sm:$0xff] }
  0x40   :  { %1309 = vmatprep.subr.mxu1 %v296_v34  ;;  %473 = vmatprep.subr.mxu0 %v296_v34  ;;  %v319_v34 = vld [vmem:[#allocation5 + $0x2a0] sm:$0xff] }
  0x41   :  { %1341 = vmatpush2.msra.mxu1 %v295_v35  ;;  %474 = vmatpush2.msra.mxu0 %v295_v35  ;;  %v384_v35 = vld [vmem:[#allocation5 + $0x4a8] sm:$0xff] }
  0x42   :  { %1310 = vmatprep.subr.mxu1 %v294_v36  ;;  %475 = vmatprep.subr.mxu0 %v294_v36  ;;  %v62_v36 = vld [vmem:[#allocation2 + $0x98] sm:$0xff] }
  0x43   :  { %1342 = vmatpush2.msra.mxu1 %v293_v37  ;;  %476 = vmatpush2.msra.mxu0 %v293_v37  ;;  %v157_v37 = vld [vmem:[#allocation2 + $0x390] sm:$0xff] }
  0x44   :  { %1311 = vmatprep.subr.mxu1 %v292_v38  ;;  %477 = vmatprep.subr.mxu0 %v292_v38  ;;  %v318_v38 = vld [vmem:[#allocation5 + $0x298] sm:$0xff] }
  0x45   :  { %1343 = vmatpush2.msra.mxu1 %v291_v39  ;;  %478 = vmatpush2.msra.mxu0 %v291_v39  ;;  %v383_v39 = vld [vmem:[#allocation5 + $0x4a0] sm:$0xff] }
  0x46   :  { %1312 = vmatprep.subr.mxu1 %v290_v40  ;;  %479 = vmatprep.subr.mxu0 %v290_v40  ;;  %v61_v40 = vld [vmem:[#allocation2 + $0x90] sm:$0xff] }
  0x47   :  { %1344 = vmatpush2.msra.mxu1 %v289_v41  ;;  %480 = vmatpush2.msra.mxu0 %v289_v41  ;;  %v317_v41 = vld [vmem:[#allocation5 + $0x290] sm:$0xff] }
  0x48   :  { %1313 = vmatprep.subr.mxu1 %v288_v42  ;;  %481 = vmatprep.subr.mxu0 %v288_v42  ;;  %v382_v42 = vld [vmem:[#allocation5 + $0x498] sm:$0xff] }
  0x49   :  { %1345 = vmatpush2.msra.mxu1 %v287_v43  ;;  %482 = vmatpush2.msra.mxu0 %v287_v43  ;;  %v316_v43 = vld [vmem:[#allocation5 + $0x288] sm:$0xff] }
  0x4a   :  { %1314 = vmatprep.subr.mxu1 %v286_v44  ;;  %483 = vmatprep.subr.mxu0 %v286_v44  ;;  %v381_v44 = vld [vmem:[#allocation5 + $0x490] sm:$0xff] }
  0x4b   :  { %1346 = vmatpush2.msra.mxu1 %v285_v45  ;;  %484 = vmatpush2.msra.mxu0 %v285_v45  ;;  %v164_v45 = vld [vmem:[#allocation2 + $0x3c8] sm:$0xff] }
  0x4c   :  { %1315 = vmatprep.subr.mxu1 %v284_v46  ;;  %485 = vmatprep.subr.mxu0 %v284_v46  ;;  %v315_v46 = vld [vmem:[#allocation5 + $0x280] sm:$0xff] }
  0x4d   :  { %1347 = vmatpush2.msra.mxu1 %v283_v47  ;;  %486 = vmatpush2.msra.mxu0 %v283_v47  ;;  %v380_v47 = vld [vmem:[#allocation5 + $0x488] sm:$0xff] }
  0x4e   :  { %1316 = vmatprep.subr.mxu1 %v282_v48  ;;  %487 = vmatprep.subr.mxu0 %v282_v48  ;;  %v68_v48 = vld [vmem:[#allocation2 + $0xc8] sm:$0xff] }
  0x4f   :  { %1348 = vmatpush2.msra.mxu1 %v281_v49  ;;  %488 = vmatpush2.msra.mxu0 %v281_v49  ;;  %v163_v49 = vld [vmem:[#allocation2 + $0x3c0] sm:$0xff] }
  0x50   :  { %1317 = vmatprep.subr.mxu1 %v280_v50  ;;  %489 = vmatprep.subr.mxu0 %v280_v50  ;;  %v314_v50 = vld [vmem:[#allocation5 + $0x278] sm:$0xff] }
  0x51   :  { %1349 = vmatpush2.msra.mxu1 %v279_v51  ;;  %490 = vmatpush2.msra.mxu0 %v279_v51  ;;  %v379_v51 = vld [vmem:[#allocation5 + $0x480] sm:$0xff] }
  0x52   :  { %1318 = vmatprep.subr.mxu1 %v278_v52  ;;  %491 = vmatprep.subr.mxu0 %v278_v52  ;;  %v67_v52 = vld [vmem:[#allocation2 + $0xc0] sm:$0xff] }
  0x53   :  { %1350 = vmatpush2.msra.mxu1 %v277_v53  ;;  %492 = vmatpush2.msra.mxu0 %v277_v53  ;;  %v313_v53 = vld [vmem:[#allocation5 + $0x270] sm:$0xff] }
  0x54   :  { %1319 = vmatprep.subr.mxu1 %v276_v54  ;;  %493 = vmatprep.subr.mxu0 %v276_v54  ;;  %v378_v54 = vld [vmem:[#allocation5 + $0x478] sm:$0xff] }
  0x55   :  { %1351 = vmatpush2.msra.mxu1 %v275_v55  ;;  %494 = vmatpush2.msra.mxu0 %v275_v55  ;;  %v312_v55 = vld [vmem:[#allocation5 + $0x268] sm:$0xff] }
  0x56   :  { %1320 = vmatprep.subr.mxu1 %v274_v56  ;;  %495 = vmatprep.subr.mxu0 %v274_v56  ;;  %v377_v56 = vld [vmem:[#allocation5 + $0x470] sm:$0xff] }
  0x57   :  { %1352 = vmatpush2.msra.mxu1 %v273_v57  ;;  %496 = vmatpush2.msra.mxu0 %v273_v57  ;;  %v170_v57 = vld [vmem:[#allocation2 + $0x3f8] sm:$0xff] }
  0x58   :  { %1321 = vmatprep.subr.mxu1 %v272_v58  ;;  %497 = vmatprep.subr.mxu0 %v272_v58  ;;  %v311_v58 = vld [vmem:[#allocation5 + $0x260] sm:$0xff] }
  0x59   :  { %1353 = vmatpush2.msra.mxu1 %v271_v59  ;;  %498 = vmatpush2.msra.mxu0 %v271_v59  ;;  %v376_v59 = vld [vmem:[#allocation5 + $0x468] sm:$0xff] }
  0x5a   :  { %1322 = vmatprep.subr.mxu1 %v270_v60  ;;  %499 = vmatprep.subr.mxu0 %v270_v60  ;;  %v74_v60 = vld [vmem:[#allocation2 + $0xf8] sm:$0xff] }
  0x5b   :  { %1354 = vmatpush2.msra.mxu1 %v269_v61  ;;  %500 = vmatpush2.msra.mxu0 %v269_v61  ;;  %v169_v61 = vld [vmem:[#allocation2 + $0x3f0] sm:$0xff] }
  0x5c   :  { %1323 = vmatprep.subr.mxu1 %v268_v62  ;;  %501 = vmatprep.subr.mxu0 %v268_v62  ;;  %v310_v62 = vld [vmem:[#allocation5 + $0x258] sm:$0xff] }
  0x5d   :  { %1355 = vmatpush2.msra.mxu1 %v267_v63  ;;  %599 = vmatprep.mubr.f32.mxu1 %v140_v0  ;;  %v73_v0 = vld [vmem:[#allocation2 + $0xf0] sm:$0xff] }
  0x5e   :  { %502 = vmatpush2.msra.mxu0 %v267_v63  ;;  %503 = vmatprep.mubr.f32.mxu0 %v44_v1  ;;  %v375_v63 = vld [vmem:[#allocation5 + $0x460] sm:$0xff]  ;;  %v309_v1 = vld [vmem:[#allocation5 + $0x250] sm:$0xff] }
  0x5f   :  { %600 = vmatmul.mubr.f32.vlgmr.msra.gmra.mxu1 %v139_v2  ;;  %696 = vmatprep.subr.mxu1 %v330_v3  ;;  %v374_v2 = vld [vmem:[#allocation5 + $0x458] sm:$0xff]  ;;  %v308_v3 = vld [vmem:[#allocation5 + $0x248] sm:$0xff] }
  0x60   :  { %504 = vmatmul.mubr.f32.vlgmr.msra.gmra.mxu0 %v43_v4  ;;  %697 = vmatpush1.msra.mxu1 %v329_v5  ;;  %v373_v4 = vld [vmem:[#allocation5 + $0x450] sm:$0xff]  ;;  %v176_v5 = vld [vmem:[#allocation2 + $0x428] sm:$0xff] }
  0x61   :  { %953 = vmatprep.subr.mxu0 %v394_v6  ;;  %698 = vmatprep.subr.mxu1 %v328_v7  ;;  %v307_v6 = vld [vmem:[#allocation5 + $0x240] sm:$0xff]  ;;  %v372_v7 = vld [vmem:[#allocation5 + $0x448] sm:$0xff] }
  0x62   :  { %954 = vmatpush1.msra.mxu0 %v393_v8  ;;  %605 = vmatprep.mubr.f32.mxu1 %v146_v9  ;;  %v80_v8 = vld [vmem:[#allocation2 + $0x128] sm:$0xff]  ;;  %v175_v9 = vld [vmem:[#allocation2 + $0x420] sm:$0xff] }
  0x63   :  { %699 = vmatpush1.msra.mxu1 %v327_v10  ;;  %955 = vmatprep.subr.mxu0 %v392_v11  ;;  %v306_v10 = vld [vmem:[#allocation5 + $0x238] sm:$0xff]  ;;  %v371_v11 = vld [vmem:[#allocation5 + $0x440] sm:$0xff] }
  0x64   :  { %509 = vmatprep.mubr.f32.mxu0 %v50_v12  ;;  %606 = vmatmul.mubr.f32.gmra.mxu1 %v145_v13  ;;  %v79_v12 = vld [vmem:[#allocation2 + $0x120] sm:$0xff]  ;;  %v305_v13 = vld [vmem:[#allocation5 + $0x230] sm:$0xff] }
  0x65   :  { %700 = vmatprep.subr.mxu1 %v326_v14  ;;  %956 = vmatpush1.msra.mxu0 %v391_v15  ;;  %v370_v14 = vld [vmem:[#allocation5 + $0x438] sm:$0xff]  ;;  %v304_v15 = vld [vmem:[#allocation5 + $0x228] sm:$0xff] }
  0x66   :  { %510 = vmatmul.mubr.f32.gmra.mxu0 %v49_v16  ;;  %701 = vmatpush1.msra.mxu1 %v325_v17  ;;  %v369_v16 = vld [vmem:[#allocation5 + $0x430] sm:$0xff]  ;;  %v182_v17 = vld [vmem:[#allocation2 + $0x458] sm:$0xff] }
  0x67   :  { %957 = vmatprep.subr.mxu0 %v390_v18  ;;  %702 = vmatprep.subr.mxu1 %v324_v19  ;;  %v303_v18 = vld [vmem:[#allocation5 + $0x220] sm:$0xff]  ;;  %v368_v19 = vld [vmem:[#allocation5 + $0x428] sm:$0xff] }
  0x68   :  { %958 = vmatpush1.msra.mxu0 %v389_v20  ;;  %611 = vmatprep.mubr.f32.mxu1 %v152_v21  ;;  %v86_v20 = vld [vmem:[#allocation2 + $0x158] sm:$0xff]  ;;  %v181_v21 = vld [vmem:[#allocation2 + $0x450] sm:$0xff] }
  0x69   :  { %703 = vmatpush1.msra.mxu1 %v323_v22  ;;  %959 = vmatprep.subr.mxu0 %v388_v23  ;;  %v302_v22 = vld [vmem:[#allocation5 + $0x218] sm:$0xff]  ;;  %v367_v23 = vld [vmem:[#allocation5 + $0x420] sm:$0xff] }
  0x6a   :  { %515 = vmatprep.mubr.f32.mxu0 %v56_v24  ;;  %612 = vmatmul.mubr.f32.gmra.mxu1 %v151_v25  ;;  %v85_v24 = vld [vmem:[#allocation2 + $0x150] sm:$0xff] }
  0x6b   :  { %704 = vmatprep.subr.mxu1 %v322_v26  ;;  %960 = vmatpush1.msra.mxu0 %v387_v27  ;;  %v301_v25 = vld [vmem:[#allocation5 + $0x210] sm:$0xff]  ;;  %v366_v26 = vld [vmem:[#allocation5 + $0x418] sm:$0xff]  ;;  %v300_v27 = vld [vmem:[#allocation5 + $0x208] sm:$0xff] }
  0x6c   :  { %516 = vmatmul.mubr.f32.gmra.mxu0 %v55_v28  ;;  %705 = vmatpush1.msra.mxu1 %v321_v29  ;;  %v365_v28 = vld [vmem:[#allocation5 + $0x410] sm:$0xff]  ;;  %v188_v29 = vld [vmem:[#allocation2 + $0x488] sm:$0xff] }
  0x6d   :  { %961 = vmatprep.subr.mxu0 %v386_v30  ;;  %706 = vmatprep.subr.mxu1 %v320_v31  ;;  %v299_v30 = vld [vmem:[#allocation5 + $0x200] sm:$0xff]  ;;  %v364_v31 = vld [vmem:[#allocation5 + $0x408] sm:$0xff] }
  0x6e   :  { %962 = vmatpush1.msra.mxu0 %v385_v32  ;;  %617 = vmatprep.mubr.f32.mxu1 %v158_v33  ;;  %v92_v32 = vld [vmem:[#allocation2 + $0x188] sm:$0xff]  ;;  %v187_v33 = vld [vmem:[#allocation2 + $0x480] sm:$0xff] }
  0x6f   :  { %707 = vmatpush1.msra.mxu1 %v319_v34  ;;  %963 = vmatprep.subr.mxu0 %v384_v35  ;;  %v362_v34 = vld [vmem:[#allocation5 + $0x3f8] sm:$0xff]  ;;  %v363_v35 = vld [vmem:[#allocation5 + $0x400] sm:$0xff] }
  0x70   :  { %521 = vmatprep.mubr.f32.mxu0 %v62_v36  ;;  %618 = vmatmul.mubr.f32.gmra.mxu1 %v157_v37  ;;  %v91_v36 = vld [vmem:[#allocation2 + $0x180] sm:$0xff]  ;;  %v361_v37 = vld [vmem:[#allocation5 + $0x3f0] sm:$0xff] }
  0x71   :  { %708 = vmatprep.subr.mxu1 %v318_v38  ;;  %964 = vmatpush1.msra.mxu0 %v383_v39  ;;  %v426_v38 = vld [vmem:[#allocation5 + $0x5f8] sm:$0xff]  ;;  %v360_v39 = vld [vmem:[#allocation5 + $0x3e8] sm:$0xff] }
  0x72   :  { %522 = vmatmul.mubr.f32.gmra.mxu0 %v61_v40  ;;  %709 = vmatpush1.msra.mxu1 %v317_v41  ;;  %v425_v40 = vld [vmem:[#allocation5 + $0x5f0] sm:$0xff]  ;;  %v194_v41 = vld [vmem:[#allocation2 + $0x4b8] sm:$0xff] }
  0x73   :  { %965 = vmatprep.subr.mxu0 %v382_v42  ;;  %710 = vmatprep.subr.mxu1 %v316_v43  ;;  %v359_v42 = vld [vmem:[#allocation5 + $0x3e0] sm:$0xff]  ;;  %v424_v43 = vld [vmem:[#allocation5 + $0x5e8] sm:$0xff] }
  0x74   :  { %966 = vmatpush1.msra.mxu0 %v381_v44  ;;  %623 = vmatprep.mubr.f32.mxu1 %v164_v45  ;;  %v98_v44 = vld [vmem:[#allocation2 + $0x1b8] sm:$0xff]  ;;  %v193_v45 = vld [vmem:[#allocation2 + $0x4b0] sm:$0xff] }
  0x75   :  { %711 = vmatpush1.msra.mxu1 %v315_v46  ;;  %967 = vmatprep.subr.mxu0 %v380_v47  ;;  %v358_v46 = vld [vmem:[#allocation5 + $0x3d8] sm:$0xff]  ;;  %v423_v47 = vld [vmem:[#allocation5 + $0x5e0] sm:$0xff] }
  0x76   :  { %527 = vmatprep.mubr.f32.mxu0 %v68_v48  ;;  %624 = vmatmul.mubr.f32.gmra.mxu1 %v163_v49  ;;  %v97_v48 = vld [vmem:[#allocation2 + $0x1b0] sm:$0xff] }
  0x77   :  { %712 = vmatprep.subr.mxu1 %v314_v50  ;;  %968 = vmatpush1.msra.mxu0 %v379_v51  ;;  %v357_v49 = vld [vmem:[#allocation5 + $0x3d0] sm:$0xff]  ;;  %v422_v50 = vld [vmem:[#allocation5 + $0x5d8] sm:$0xff]  ;;  %v356_v51 = vld [vmem:[#allocation5 + $0x3c8] sm:$0xff] }
  0x78   :  { %528 = vmatmul.mubr.f32.gmra.mxu0 %v67_v52  ;;  %713 = vmatpush1.msra.mxu1 %v313_v53  ;;  %v421_v52 = vld [vmem:[#allocation5 + $0x5d0] sm:$0xff]  ;;  %v200_v53 = vld [vmem:[#allocation2 + $0x4e8] sm:$0xff] }
  0x79   :  { %969 = vmatprep.subr.mxu0 %v378_v54  ;;  %714 = vmatprep.subr.mxu1 %v312_v55  ;;  %v355_v54 = vld [vmem:[#allocation5 + $0x3c0] sm:$0xff]  ;;  %v420_v55 = vld [vmem:[#allocation5 + $0x5c8] sm:$0xff] }
  0x7a   :  { %970 = vmatpush1.msra.mxu0 %v377_v56  ;;  %629 = vmatprep.mubr.f32.mxu1 %v170_v57  ;;  %v104_v56 = vld [vmem:[#allocation2 + $0x1e8] sm:$0xff]  ;;  %v199_v57 = vld [vmem:[#allocation2 + $0x4e0] sm:$0xff] }
  0x7b   :  { %715 = vmatpush1.msra.mxu1 %v311_v58  ;;  %971 = vmatprep.subr.mxu0 %v376_v59  ;;  %v354_v58 = vld [vmem:[#allocation5 + $0x3b8] sm:$0xff]  ;;  %v419_v59 = vld [vmem:[#allocation5 + $0x5c0] sm:$0xff] }
  0x7c   :  { %533 = vmatprep.mubr.f32.mxu0 %v74_v60  ;;  %630 = vmatmul.mubr.f32.gmra.mxu1 %v169_v61  ;;  %v103_v60 = vld [vmem:[#allocation2 + $0x1e0] sm:$0xff]  ;;  %v353_v61 = vld [vmem:[#allocation5 + $0x3b0] sm:$0xff] }
  0x7d   :  { %716 = vmatprep.subr.mxu1 %v310_v62  ;;  %972 = vmatpush1.msra.mxu0 %v375_v63  ;;  %v418_v62 = vld [vmem:[#allocation5 + $0x5b8] sm:$0xff]  ;;  %v352_v63 = vld [vmem:[#allocation5 + $0x3a8] sm:$0xff] }
  0x7e   :  { %534 = vmatmul.mubr.f32.gmra.mxu0 %v73_v0  ;;  %717 = vmatpush1.msra.mxu1 %v309_v1  ;;  %v417_v0 = vld [vmem:[#allocation5 + $0x5b0] sm:$0xff]  ;;  %v206_v1 = vld [vmem:[#allocation2 + $0x518] sm:$0xff] }
  0x7f   :  { %973 = vmatprep.subr.mxu0 %v374_v2  ;;  %718 = vmatprep.subr.mxu1 %v308_v3  ;;  %v351_v2 = vld [vmem:[#allocation5 + $0x3a0] sm:$0xff]  ;;  %v416_v3 = vld [vmem:[#allocation5 + $0x5a8] sm:$0xff] }
  0x80   :  { %974 = vmatpush1.msra.mxu0 %v373_v4  ;;  %635 = vmatprep.mubr.f32.mxu1 %v176_v5  ;;  %v110_v4 = vld [vmem:[#allocation2 + $0x218] sm:$0xff]  ;;  %v205_v5 = vld [vmem:[#allocation2 + $0x510] sm:$0xff] }
  0x81   :  { %719 = vmatpush1.msra.mxu1 %v307_v6  ;;  %975 = vmatprep.subr.mxu0 %v372_v7  ;;  %v350_v6 = vld [vmem:[#allocation5 + $0x398] sm:$0xff]  ;;  %v415_v7 = vld [vmem:[#allocation5 + $0x5a0] sm:$0xff] }
  0x82   :  { %539 = vmatprep.mubr.f32.mxu0 %v80_v8  ;;  %636 = vmatmul.mubr.f32.gmra.mxu1 %v175_v9  ;;  %v109_v8 = vld [vmem:[#allocation2 + $0x210] sm:$0xff] }
  0x83   :  { %720 = vmatprep.subr.mxu1 %v306_v10  ;;  %976 = vmatpush1.msra.mxu0 %v371_v11  ;;  %v349_v9 = vld [vmem:[#allocation5 + $0x390] sm:$0xff]  ;;  %v414_v10 = vld [vmem:[#allocation5 + $0x598] sm:$0xff]  ;;  %v348_v11 = vld [vmem:[#allocation5 + $0x388] sm:$0xff] }
  0x84   :  { %540 = vmatmul.mubr.f32.gmra.mxu0 %v79_v12  ;;  %721 = vmatpush1.msra.mxu1 %v305_v13  ;;  %v413_v12 = vld [vmem:[#allocation5 + $0x590] sm:$0xff]  ;;  %v212_v13 = vld [vmem:[#allocation2 + $0x548] sm:$0xff] }
  0x85   :  { %977 = vmatprep.subr.mxu0 %v370_v14  ;;  %722 = vmatprep.subr.mxu1 %v304_v15  ;;  %v347_v14 = vld [vmem:[#allocation5 + $0x380] sm:$0xff]  ;;  %v412_v15 = vld [vmem:[#allocation5 + $0x588] sm:$0xff] }
  0x86   :  { %978 = vmatpush1.msra.mxu0 %v369_v16  ;;  %641 = vmatprep.mubr.f32.mxu1 %v182_v17  ;;  %v116_v16 = vld [vmem:[#allocation2 + $0x248] sm:$0xff]  ;;  %v211_v17 = vld [vmem:[#allocation2 + $0x540] sm:$0xff] }
  0x87   :  { %723 = vmatpush1.msra.mxu1 %v303_v18  ;;  %979 = vmatprep.subr.mxu0 %v368_v19  ;;  %v346_v18 = vld [vmem:[#allocation5 + $0x378] sm:$0xff]  ;;  %v411_v19 = vld [vmem:[#allocation5 + $0x580] sm:$0xff] }
  0x88   :  { %545 = vmatprep.mubr.f32.mxu0 %v86_v20  ;;  %642 = vmatmul.mubr.f32.gmra.mxu1 %v181_v21  ;;  %v115_v20 = vld [vmem:[#allocation2 + $0x240] sm:$0xff]  ;;  %v345_v21 = vld [vmem:[#allocation5 + $0x370] sm:$0xff] }
  0x89   :  { %724 = vmatprep.subr.mxu1 %v302_v22  ;;  %980 = vmatpush1.msra.mxu0 %v367_v23  ;;  %v410_v22 = vld [vmem:[#allocation5 + $0x578] sm:$0xff]  ;;  %v344_v23 = vld [vmem:[#allocation5 + $0x368] sm:$0xff] }
  0x8a   :  { %546 = vmatmul.mubr.f32.gmra.mxu0 %v85_v24  ;;  %725 = vmatpush1.msra.mxu1 %v301_v25  ;;  %v409_v24 = vld [vmem:[#allocation5 + $0x570] sm:$0xff]  ;;  %v218_v25 = vld [vmem:[#allocation2 + $0x578] sm:$0xff] }
  0x8b   :  { %981 = vmatprep.subr.mxu0 %v366_v26  ;;  %726 = vmatprep.subr.mxu1 %v300_v27  ;;  %v343_v26 = vld [vmem:[#allocation5 + $0x360] sm:$0xff]  ;;  %v408_v27 = vld [vmem:[#allocation5 + $0x568] sm:$0xff] }
  0x8c   :  { %982 = vmatpush1.msra.mxu0 %v365_v28  ;;  %647 = vmatprep.mubr.f32.mxu1 %v188_v29  ;;  %v122_v28 = vld [vmem:[#allocation2 + $0x278] sm:$0xff]  ;;  %v217_v29 = vld [vmem:[#allocation2 + $0x570] sm:$0xff] }
  0x8d   :  { %727 = vmatpush1.msra.mxu1 %v299_v30  ;;  %983 = vmatprep.subr.mxu0 %v364_v31  ;;  %v342_v30 = vld [vmem:[#allocation5 + $0x358] sm:$0xff]  ;;  %v407_v31 = vld [vmem:[#allocation5 + $0x560] sm:$0xff] }
  0x8e   :  { %551 = vmatprep.mubr.f32.mxu0 %v92_v32  ;;  %648 = vmatmul.mubr.f32.gmra.mxu1 %v187_v33  ;;  %v121_v32 = vld [vmem:[#allocation2 + $0x270] sm:$0xff] }
  0x8f   :  { %728 = vmatprep.subr.mxu1 %v362_v34  ;;  %984 = vmatpush1.msra.mxu0 %v363_v35  ;;  %v341_v33 = vld [vmem:[#allocation5 + $0x350] sm:$0xff]  ;;  %v406_v34 = vld [vmem:[#allocation5 + $0x558] sm:$0xff]  ;;  %v340_v35 = vld [vmem:[#allocation5 + $0x348] sm:$0xff] }
  0x90   :  { %552 = vmatmul.mubr.f32.gmra.mxu0 %v91_v36  ;;  %729 = vmatpush2.msra.mxu1 %v361_v37  ;;  %v405_v36 = vld [vmem:[#allocation5 + $0x550] sm:$0xff]  ;;  %v224_v37 = vld [vmem:[#allocation2 + $0x5a8] sm:$0xff] }
  0x91   :  { %985 = vmatprep.subr.mxu0 %v426_v38  ;;  %730 = vmatprep.subr.mxu1 %v360_v39  ;;  %v339_v38 = vld [vmem:[#allocation5 + $0x340] sm:$0xff]  ;;  %v404_v39 = vld [vmem:[#allocation5 + $0x548] sm:$0xff] }
  0x92   :  { %986 = vmatpush2.msra.mxu0 %v425_v40  ;;  %653 = vmatprep.mubr.f32.mxu1 %v194_v41  ;;  %v128_v40 = vld [vmem:[#allocation2 + $0x2a8] sm:$0xff]  ;;  %v223_v41 = vld [vmem:[#allocation2 + $0x5a0] sm:$0xff] }
  0x93   :  { %731 = vmatpush2.msra.mxu1 %v359_v42  ;;  %987 = vmatprep.subr.mxu0 %v424_v43  ;;  %v338_v42 = vld [vmem:[#allocation5 + $0x338] sm:$0xff]  ;;  %v403_v43 = vld [vmem:[#allocation5 + $0x540] sm:$0xff] }
  0x94   :  { %557 = vmatprep.mubr.f32.mxu0 %v98_v44  ;;  %654 = vmatmul.mubr.f32.gmra.mxu1 %v193_v45  ;;  %v127_v44 = vld [vmem:[#allocation2 + $0x2a0] sm:$0xff]  ;;  %v337_v45 = vld [vmem:[#allocation5 + $0x330] sm:$0xff] }
  0x95   :  { %732 = vmatprep.subr.mxu1 %v358_v46  ;;  %988 = vmatpush2.msra.mxu0 %v423_v47  ;;  %v402_v46 = vld [vmem:[#allocation5 + $0x538] sm:$0xff]  ;;  %v336_v47 = vld [vmem:[#allocation5 + $0x328] sm:$0xff] }
  0x96   :  { %558 = vmatmul.mubr.f32.gmra.mxu0 %v97_v48  ;;  %733 = vmatpush2.msra.mxu1 %v357_v49  ;;  %v401_v48 = vld [vmem:[#allocation5 + $0x530] sm:$0xff]  ;;  %v230_v49 = vld [vmem:[#allocation2 + $0x5d8] sm:$0xff] }
  0x97   :  { %989 = vmatprep.subr.mxu0 %v422_v50  ;;  %734 = vmatprep.subr.mxu1 %v356_v51  ;;  %v335_v50 = vld [vmem:[#allocation5 + $0x320] sm:$0xff]  ;;  %v400_v51 = vld [vmem:[#allocation5 + $0x528] sm:$0xff] }
  0x98   :  { %990 = vmatpush2.msra.mxu0 %v421_v52  ;;  %659 = vmatprep.mubr.f32.mxu1 %v200_v53  ;;  %v134_v52 = vld [vmem:[#allocation2 + $0x2d8] sm:$0xff]  ;;  %v229_v53 = vld [vmem:[#allocation2 + $0x5d0] sm:$0xff] }
  0x99   :  { %735 = vmatpush2.msra.mxu1 %v355_v54  ;;  %991 = vmatprep.subr.mxu0 %v420_v55  ;;  %v334_v54 = vld [vmem:[#allocation5 + $0x318] sm:$0xff]  ;;  %v399_v55 = vld [vmem:[#allocation5 + $0x520] sm:$0xff] }
  0x9a   :  { %563 = vmatprep.mubr.f32.mxu0 %v104_v56  ;;  %660 = vmatmul.mubr.f32.gmra.mxu1 %v199_v57  ;;  %v133_v56 = vld [vmem:[#allocation2 + $0x2d0] sm:$0xff] }
  0x9b   :  { %736 = vmatprep.subr.mxu1 %v354_v58  ;;  %992 = vmatpush2.msra.mxu0 %v419_v59  ;;  %v333_v57 = vld [vmem:[#allocation5 + $0x310] sm:$0xff]  ;;  %v398_v58 = vld [vmem:[#allocation5 + $0x518] sm:$0xff]  ;;  %v332_v59 = vld [vmem:[#allocation5 + $0x308] sm:$0xff] }
  0x9c   :  { %564 = vmatmul.mubr.f32.gmra.mxu0 %v103_v60  ;;  %737 = vmatpush2.msra.mxu1 %v353_v61  ;;  %v397_v60 = vld [vmem:[#allocation5 + $0x510] sm:$0xff]  ;;  %v331_v61 = vld [vmem:[#allocation5 + $0x300] sm:$0xff] }
  0x9d   :  { %993 = vmatprep.subr.mxu0 %v418_v62  ;;  %738 = vmatprep.subr.mxu1 %v352_v63  ;;  %v46_v62 = vld [vmem:[#allocation2 + $0x18] sm:$0xff]  ;;  %v396_v63 = vld [vmem:[#allocation5 + $0x508] sm:$0xff] }
  0x9e   :  { %994 = vmatpush2.msra.mxu0 %v417_v0  ;;  %665 = vmatprep.mubr.f32.mxu1 %v206_v1  ;;  %v45_v0 = vld [vmem:[#allocation2 + $0x10] sm:$0xff]  ;;  %v395_v1 = vld [vmem:[#allocation5 + $0x500] sm:$0xff] }
  0x9f   :  { %739 = vmatpush2.msra.mxu1 %v351_v2  ;;  %995 = vmatprep.subr.mxu0 %v416_v3  ;;  %v48_v2 = vld [vmem:[#allocation2 + $0x28] sm:$0xff] }
  0xa0   :  { %569 = vmatprep.mubr.f32.mxu0 %v110_v4  ;;  %666 = vmatmul.mubr.f32.gmra.mxu1 %v205_v5  ;;  %v52_v3 = vld [vmem:[#allocation2 + $0x48] sm:$0xff]  ;;  %v47_v4 = vld [vmem:[#allocation2 + $0x20] sm:$0xff]  ;;  %v54_v5 = vld [vmem:[#allocation2 + $0x58] sm:$0xff] }
  0xa1   :  { %740 = vmatprep.subr.mxu1 %v350_v6  ;;  %996 = vmatpush2.msra.mxu0 %v415_v7  ;;  %v51_v6 = vld [vmem:[#allocation2 + $0x40] sm:$0xff]  ;;  %v58_v7 = vld [vmem:[#allocation2 + $0x78] sm:$0xff] }
  0xa2   :  { %570 = vmatmul.mubr.f32.gmra.mxu0 %v109_v8  ;;  %741 = vmatpush2.msra.mxu1 %v349_v9  ;;  %v53_v8 = vld [vmem:[#allocation2 + $0x50] sm:$0xff]  ;;  %v60_v9 = vld [vmem:[#allocation2 + $0x88] sm:$0xff] }
  0xa3   :  { %997 = vmatprep.subr.mxu0 %v414_v10  ;;  %742 = vmatprep.subr.mxu1 %v348_v11  ;;  %v57_v10 = vld [vmem:[#allocation2 + $0x70] sm:$0xff]  ;;  %v64_v11 = vld [vmem:[#allocation2 + $0xa8] sm:$0xff] }
  0xa4   :  { %998 = vmatpush2.msra.mxu0 %v413_v12  ;;  %671 = vmatprep.mubr.f32.mxu1 %v212_v13  ;;  %v59_v12 = vld [vmem:[#allocation2 + $0x80] sm:$0xff]  ;;  %v66_v13 = vld [vmem:[#allocation2 + $0xb8] sm:$0xff] }
  0xa5   :  { %743 = vmatpush2.msra.mxu1 %v347_v14  ;;  %999 = vmatprep.subr.mxu0 %v412_v15  ;;  %v63_v14 = vld [vmem:[#allocation2 + $0xa0] sm:$0xff]  ;;  %v70_v15 = vld [vmem:[#allocation2 + $0xd8] sm:$0xff] }
  0xa6   :  { %575 = vmatprep.mubr.f32.mxu0 %v116_v16  ;;  %672 = vmatmul.mubr.f32.gmra.mxu1 %v211_v17  ;;  %v65_v16 = vld [vmem:[#allocation2 + $0xb0] sm:$0xff]  ;;  %v72_v17 = vld [vmem:[#allocation2 + $0xe8] sm:$0xff] }
  0xa7   :  { %744 = vmatprep.subr.mxu1 %v346_v18  ;;  %1000 = vmatpush2.msra.mxu0 %v411_v19  ;;  %v69_v18 = vld [vmem:[#allocation2 + $0xd0] sm:$0xff]  ;;  %v76_v19 = vld [vmem:[#allocation2 + $0x108] sm:$0xff] }
  0xa8   :  { %576 = vmatmul.mubr.f32.gmra.mxu0 %v115_v20  ;;  %745 = vmatpush2.msra.mxu1 %v345_v21  ;;  %v71_v20 = vld [vmem:[#allocation2 + $0xe0] sm:$0xff]  ;;  %v78_v21 = vld [vmem:[#allocation2 + $0x118] sm:$0xff] }
  0xa9   :  { %1001 = vmatprep.subr.mxu0 %v410_v22  ;;  %746 = vmatprep.subr.mxu1 %v344_v23  ;;  %v75_v22 = vld [vmem:[#allocation2 + $0x100] sm:$0xff]  ;;  %v82_v23 = vld [vmem:[#allocation2 + $0x138] sm:$0xff] }
  0xaa   :  { %1002 = vmatpush2.msra.mxu0 %v409_v24  ;;  %677 = vmatprep.mubr.f32.mxu1 %v218_v25  ;;  %v77_v24 = vld [vmem:[#allocation2 + $0x110] sm:$0xff]  ;;  %v84_v25 = vld [vmem:[#allocation2 + $0x148] sm:$0xff] }
  0xab   :  { %747 = vmatpush2.msra.mxu1 %v343_v26  ;;  %1003 = vmatprep.subr.mxu0 %v408_v27  ;;  %v81_v26 = vld [vmem:[#allocation2 + $0x130] sm:$0xff]  ;;  %v88_v27 = vld [vmem:[#allocation2 + $0x168] sm:$0xff] }
  0xac   :  { %581 = vmatprep.mubr.f32.mxu0 %v122_v28  ;;  %678 = vmatmul.mubr.f32.gmra.mxu1 %v217_v29  ;;  %v83_v28 = vld [vmem:[#allocation2 + $0x140] sm:$0xff]  ;;  %v90_v29 = vld [vmem:[#allocation2 + $0x178] sm:$0xff] }
  0xad   :  { %748 = vmatprep.subr.mxu1 %v342_v30  ;;  %1004 = vmatpush2.msra.mxu0 %v407_v31  ;;  %v87_v30 = vld [vmem:[#allocation2 + $0x160] sm:$0xff]  ;;  %v94_v31 = vld [vmem:[#allocation2 + $0x198] sm:$0xff] }
  0xae   :  { %582 = vmatmul.mubr.f32.gmra.mxu0 %v121_v32  ;;  %749 = vmatpush2.msra.mxu1 %v341_v33  ;;  %v89_v32 = vld [vmem:[#allocation2 + $0x170] sm:$0xff]  ;;  %v96_v33 = vld [vmem:[#allocation2 + $0x1a8] sm:$0xff] }
  0xaf   :  { %1005 = vmatprep.subr.mxu0 %v406_v34  ;;  %750 = vmatprep.subr.mxu1 %v340_v35  ;;  %v93_v34 = vld [vmem:[#allocation2 + $0x190] sm:$0xff]  ;;  %v100_v35 = vld [vmem:[#allocation2 + $0x1c8] sm:$0xff] }
  0xb0   :  { %1006 = vmatpush2.msra.mxu0 %v405_v36  ;;  %683 = vmatprep.mubr.f32.mxu1 %v224_v37  ;;  %v95_v36 = vld [vmem:[#allocation2 + $0x1a0] sm:$0xff]  ;;  %v102_v37 = vld [vmem:[#allocation2 + $0x1d8] sm:$0xff] }
  0xb1   :  { %751 = vmatpush2.msra.mxu1 %v339_v38  ;;  %1007 = vmatprep.subr.mxu0 %v404_v39  ;;  %v99_v38 = vld [vmem:[#allocation2 + $0x1c0] sm:$0xff]  ;;  %v106_v39 = vld [vmem:[#allocation2 + $0x1f8] sm:$0xff] }
  0xb2   :  { %587 = vmatprep.mubr.f32.mxu0 %v128_v40  ;;  %684 = vmatmul.mubr.f32.gmra.mxu1 %v223_v41  ;;  %v101_v40 = vld [vmem:[#allocation2 + $0x1d0] sm:$0xff]  ;;  %v108_v41 = vld [vmem:[#allocation2 + $0x208] sm:$0xff] }
  0xb3   :  { %752 = vmatprep.subr.mxu1 %v338_v42  ;;  %1008 = vmatpush2.msra.mxu0 %v403_v43  ;;  %v105_v42 = vld [vmem:[#allocation2 + $0x1f0] sm:$0xff]  ;;  %v112_v43 = vld [vmem:[#allocation2 + $0x228] sm:$0xff] }
  0xb4   :  { %588 = vmatmul.mubr.f32.gmra.mxu0 %v127_v44  ;;  %753 = vmatpush2.msra.mxu1 %v337_v45  ;;  %v107_v44 = vld [vmem:[#allocation2 + $0x200] sm:$0xff]  ;;  %v114_v45 = vld [vmem:[#allocation2 + $0x238] sm:$0xff] }
  0xb5   :  { %1009 = vmatprep.subr.mxu0 %v402_v46  ;;  %754 = vmatprep.subr.mxu1 %v336_v47  ;;  %v111_v46 = vld [vmem:[#allocation2 + $0x220] sm:$0xff]  ;;  %v118_v47 = vld [vmem:[#allocation2 + $0x258] sm:$0xff] }
  0xb6   :  { %1010 = vmatpush2.msra.mxu0 %v401_v48  ;;  %689 = vmatprep.mubr.f32.mxu1 %v230_v49  ;;  %v113_v48 = vld [vmem:[#allocation2 + $0x230] sm:$0xff]  ;;  %v120_v49 = vld [vmem:[#allocation2 + $0x268] sm:$0xff] }
  0xb7   :  { %755 = vmatpush2.msra.mxu1 %v335_v50  ;;  %1011 = vmatprep.subr.mxu0 %v400_v51  ;;  %v117_v50 = vld [vmem:[#allocation2 + $0x250] sm:$0xff]  ;;  %v124_v51 = vld [vmem:[#allocation2 + $0x288] sm:$0xff] }
  0xb8   :  { %593 = vmatprep.mubr.f32.mxu0 %v134_v52  ;;  %690 = vmatmul.mubr.f32.gmra.mxu1 %v229_v53  ;;  %v119_v52 = vld [vmem:[#allocation2 + $0x260] sm:$0xff]  ;;  %v126_v53 = vld [vmem:[#allocation2 + $0x298] sm:$0xff] }
  0xb9   :  { %756 = vmatprep.subr.mxu1 %v334_v54  ;;  %1012 = vmatpush2.msra.mxu0 %v399_v55  ;;  %v123_v54 = vld [vmem:[#allocation2 + $0x280] sm:$0xff]  ;;  %v130_v55 = vld [vmem:[#allocation2 + $0x2b8] sm:$0xff] }
  0xba   :  { %594 = vmatmul.mubr.f32.gmra.mxu0 %v133_v56  ;;  %757 = vmatpush2.msra.mxu1 %v333_v57  ;;  %v125_v56 = vld [vmem:[#allocation2 + $0x290] sm:$0xff]  ;;  %v132_v57 = vld [vmem:[#allocation2 + $0x2c8] sm:$0xff] }
  0xbb   :  { %1013 = vmatprep.subr.mxu0 %v398_v58  ;;  %758 = vmatprep.subr.mxu1 %v332_v59  ;;  %v129_v58 = vld [vmem:[#allocation2 + $0x2b0] sm:$0xff]  ;;  %v136_v59 = vld [vmem:[#allocation2 + $0x2e8] sm:$0xff] }
  0xbc   :  { %1014 = vmatpush2.msra.mxu0 %v397_v60  ;;  %759 = vmatpush2.msra.mxu1 %v331_v61  ;;  %v131_v60 = vld [vmem:[#allocation2 + $0x2c0] sm:$0xff]  ;;  %v138_v61 = vld [vmem:[#allocation2 + $0x2f8] sm:$0xff] }
  0xbd   :  { %760 = vmatprep.mubr.f32.mxu1 %v46_v62  ;;  %1015 = vmatprep.subr.mxu0 %v396_v63  ;;  %v135_v62 = vld [vmem:[#allocation2 + $0x2e0] sm:$0xff]  ;;  %v142_v63 = vld [vmem:[#allocation2 + $0x318] sm:$0xff] }
  0xbe   :  { %761 = vmatmul.mubr.f32.vlgmr.msra.gmra.mxu1 %v45_v0  ;;  %1016 = vmatpush2.msra.mxu0 %v395_v1  ;;  %v137_v0 = vld [vmem:[#allocation2 + $0x2f0] sm:$0xff]  ;;  %v144_v1 = vld [vmem:[#allocation2 + $0x328] sm:$0xff] }
  0xbf   :  { %1017 = vmatprep.mubr.f32.mxu0 %v48_v2  ;;  %766 = vmatprep.mubr.f32.mxu1 %v52_v3  ;;  %v141_v2 = vld [vmem:[#allocation2 + $0x310] sm:$0xff]  ;;  %v148_v3 = vld [vmem:[#allocation2 + $0x348] sm:$0xff] }
  0xc0   :  { %1018 = vmatmul.mubr.f32.vlgmr.msra.gmra.mxu0 %v47_v4  ;;  %v143_v4 = vld [vmem:[#allocation2 + $0x320] sm:$0xff] }
  0xc1   :  { %1023 = vmatprep.mubr.f32.mxu0 %v54_v5  ;;  %v150_v5 = vld [vmem:[#allocation2 + $0x358] sm:$0xff] }
  0xc2   :  { %767 = vmatmul.mubr.f32.gmra.mxu1 %v51_v6  ;;  %v147_v6 = vld [vmem:[#allocation2 + $0x340] sm:$0xff] }
  0xc3   :  { %772 = vmatprep.mubr.f32.mxu1 %v58_v7  ;;  %v154_v7 = vld [vmem:[#allocation2 + $0x378] sm:$0xff] }
  0xc4   :  { %1024 = vmatmul.mubr.f32.gmra.mxu0 %v53_v8  ;;  %v149_v8 = vld [vmem:[#allocation2 + $0x350] sm:$0xff] }
  0xc5   :  { %1029 = vmatprep.mubr.f32.mxu0 %v60_v9  ;;  %v156_v9 = vld [vmem:[#allocation2 + $0x388] sm:$0xff] }
  0xc6   :  { %773 = vmatmul.mubr.f32.gmra.mxu1 %v57_v10  ;;  %v153_v10 = vld [vmem:[#allocation2 + $0x370] sm:$0xff] }
  0xc7   :  { %778 = vmatprep.mubr.f32.mxu1 %v64_v11  ;;  %v160_v11 = vld [vmem:[#allocation2 + $0x3a8] sm:$0xff] }
  0xc8   :  { %1030 = vmatmul.mubr.f32.gmra.mxu0 %v59_v12  ;;  %v155_v12 = vld [vmem:[#allocation2 + $0x380] sm:$0xff] }
  0xc9   :  { %1035 = vmatprep.mubr.f32.mxu0 %v66_v13  ;;  %v162_v13 = vld [vmem:[#allocation2 + $0x3b8] sm:$0xff] }
  0xca   :  { %779 = vmatmul.mubr.f32.gmra.mxu1 %v63_v14  ;;  %v159_v14 = vld [vmem:[#allocation2 + $0x3a0] sm:$0xff] }
  0xcb   :  { %784 = vmatprep.mubr.f32.mxu1 %v70_v15  ;;  %v166_v15 = vld [vmem:[#allocation2 + $0x3d8] sm:$0xff] }
  0xcc   :  { %1036 = vmatmul.mubr.f32.gmra.mxu0 %v65_v16  ;;  %v161_v16 = vld [vmem:[#allocation2 + $0x3b0] sm:$0xff] }
  0xcd   :  { %1041 = vmatprep.mubr.f32.mxu0 %v72_v17  ;;  %v168_v17 = vld [vmem:[#allocation2 + $0x3e8] sm:$0xff] }
  0xce   :  { %785 = vmatmul.mubr.f32.gmra.mxu1 %v69_v18  ;;  %v165_v18 = vld [vmem:[#allocation2 + $0x3d0] sm:$0xff] }
  0xcf   :  { %790 = vmatprep.mubr.f32.mxu1 %v76_v19  ;;  %v172_v19 = vld [vmem:[#allocation2 + $0x408] sm:$0xff] }
  0xd0   :  { %1042 = vmatmul.mubr.f32.gmra.mxu0 %v71_v20  ;;  %v167_v20 = vld [vmem:[#allocation2 + $0x3e0] sm:$0xff] }
  0xd1   :  { %1047 = vmatprep.mubr.f32.mxu0 %v78_v21  ;;  %v174_v21 = vld [vmem:[#allocation2 + $0x418] sm:$0xff] }
  0xd2   :  { %791 = vmatmul.mubr.f32.gmra.mxu1 %v75_v22  ;;  %v171_v22 = vld [vmem:[#allocation2 + $0x400] sm:$0xff] }
  0xd3   :  { %796 = vmatprep.mubr.f32.mxu1 %v82_v23  ;;  %v178_v23 = vld [vmem:[#allocation2 + $0x438] sm:$0xff] }
  0xd4   :  { %1048 = vmatmul.mubr.f32.gmra.mxu0 %v77_v24  ;;  %v173_v24 = vld [vmem:[#allocation2 + $0x410] sm:$0xff] }
  0xd5   :  { %1053 = vmatprep.mubr.f32.mxu0 %v84_v25  ;;  %v180_v25 = vld [vmem:[#allocation2 + $0x448] sm:$0xff] }
  0xd6   :  { %797 = vmatmul.mubr.f32.gmra.mxu1 %v81_v26  ;;  %v177_v26 = vld [vmem:[#allocation2 + $0x430] sm:$0xff] }
  0xd7   :  { %802 = vmatprep.mubr.f32.mxu1 %v88_v27  ;;  %v184_v27 = vld [vmem:[#allocation2 + $0x468] sm:$0xff] }
  0xd8   :  { %1054 = vmatmul.mubr.f32.gmra.mxu0 %v83_v28  ;;  %v179_v28 = vld [vmem:[#allocation2 + $0x440] sm:$0xff] }
  0xd9   :  { %1059 = vmatprep.mubr.f32.mxu0 %v90_v29  ;;  %v186_v29 = vld [vmem:[#allocation2 + $0x478] sm:$0xff] }
  0xda   :  { %803 = vmatmul.mubr.f32.gmra.mxu1 %v87_v30  ;;  %v183_v30 = vld [vmem:[#allocation2 + $0x460] sm:$0xff] }
  0xdb   :  { %808 = vmatprep.mubr.f32.mxu1 %v94_v31  ;;  %v190_v31 = vld [vmem:[#allocation2 + $0x498] sm:$0xff] }
  0xdc   :  { %1060 = vmatmul.mubr.f32.gmra.mxu0 %v89_v32  ;;  %v185_v32 = vld [vmem:[#allocation2 + $0x470] sm:$0xff] }
  0xdd   :  { %1065 = vmatprep.mubr.f32.mxu0 %v96_v33  ;;  %v192_v33 = vld [vmem:[#allocation2 + $0x4a8] sm:$0xff] }
  0xde   :  { %809 = vmatmul.mubr.f32.gmra.mxu1 %v93_v34  ;;  %v189_v34 = vld [vmem:[#allocation2 + $0x490] sm:$0xff] }
  0xdf   :  { %814 = vmatprep.mubr.f32.mxu1 %v100_v35  ;;  %v196_v35 = vld [vmem:[#allocation2 + $0x4c8] sm:$0xff] }
  0xe0   :  { %1066 = vmatmul.mubr.f32.gmra.mxu0 %v95_v36  ;;  %v191_v36 = vld [vmem:[#allocation2 + $0x4a0] sm:$0xff] }
  0xe1   :  { %1071 = vmatprep.mubr.f32.mxu0 %v102_v37  ;;  %v198_v37 = vld [vmem:[#allocation2 + $0x4d8] sm:$0xff] }
  0xe2   :  { %815 = vmatmul.mubr.f32.gmra.mxu1 %v99_v38  ;;  %v195_v38 = vld [vmem:[#allocation2 + $0x4c0] sm:$0xff] }
  0xe3   :  { %820 = vmatprep.mubr.f32.mxu1 %v106_v39 }
  0xe4   :  { %1072 = vmatmul.mubr.f32.gmra.mxu0 %v101_v40  ;;  %v202_v40 = vld [vmem:[#allocation2 + $0x4f8] sm:$0xff] }
  0xe5   :  { %1077 = vmatprep.mubr.f32.mxu0 %v108_v41 }
  0xe6   :  { %821 = vmatmul.mubr.f32.gmra.mxu1 %v105_v42  ;;  %v197_v42 = vld [vmem:[#allocation2 + $0x4d0] sm:$0xff] }
  0xe7   :  { %826 = vmatprep.mubr.f32.mxu1 %v112_v43 }
  0xe8   :  { %1078 = vmatmul.mubr.f32.gmra.mxu0 %v107_v44  ;;  %v204_v44 = vld [vmem:[#allocation2 + $0x508] sm:$0xff] }
  0xe9   :  { %1083 = vmatprep.mubr.f32.mxu0 %v114_v45 }
  0xea   :  { %827 = vmatmul.mubr.f32.gmra.mxu1 %v111_v46  ;;  %v201_v46 = vld [vmem:[#allocation2 + $0x4f0] sm:$0xff] }
  0xeb   :  { %832 = vmatprep.mubr.f32.mxu1 %v118_v47  ;;  %v208_v47 = vld [vmem:[#allocation2 + $0x528] sm:$0xff] }
  0xec   :  { %1084 = vmatmul.mubr.f32.gmra.mxu0 %v113_v48 }
  0xed   :  { %1089 = vmatprep.mubr.f32.mxu0 %v120_v49  ;;  %v203_v49 = vld [vmem:[#allocation2 + $0x500] sm:$0xff] }
  0xee   :  { %833 = vmatmul.mubr.f32.gmra.mxu1 %v117_v50  ;;  %v210_v50 = vld [vmem:[#allocation2 + $0x538] sm:$0xff] }
  0xef   :  { %838 = vmatprep.mubr.f32.mxu1 %v124_v51 }
  0xf0   :  { %1090 = vmatmul.mubr.f32.gmra.mxu0 %v119_v52 }
  0xf1   :  { %1095 = vmatprep.mubr.f32.mxu0 %v126_v53  ;;  %v207_v53 = vld [vmem:[#allocation2 + $0x520] sm:$0xff] }
  0xf2   :  { %839 = vmatmul.mubr.f32.gmra.mxu1 %v123_v54  ;;  %v214_v54 = vld [vmem:[#allocation2 + $0x558] sm:$0xff] }
  0xf3   :  { %844 = vmatprep.mubr.f32.mxu1 %v130_v55 }
  0xf4   :  { %1096 = vmatmul.mubr.f32.gmra.mxu0 %v125_v56  ;;  %v209_v56 = vld [vmem:[#allocation2 + $0x530] sm:$0xff] }
  0xf5   :  { %1101 = vmatprep.mubr.f32.mxu0 %v132_v57  ;;  %v216_v57 = vld [vmem:[#allocation2 + $0x568] sm:$0xff] }
  0xf6   :  { %845 = vmatmul.mubr.f32.gmra.mxu1 %v129_v58 }
  0xf7   :  { %850 = vmatprep.mubr.f32.mxu1 %v136_v59  ;;  %v213_v59 = vld [vmem:[#allocation2 + $0x550] sm:$0xff] }
  0xf8   :  { %1102 = vmatmul.mubr.f32.gmra.mxu0 %v131_v60  ;;  %v220_v60 = vld [vmem:[#allocation2 + $0x588] sm:$0xff] }
  0xf9   :  { %1107 = vmatprep.mubr.f32.mxu0 %v138_v61 }
  0xfa   :  { %851 = vmatmul.mubr.f32.gmra.mxu1 %v135_v62 }
  0xfb   :  { %856 = vmatprep.mubr.f32.mxu1 %v142_v63  ;;  %v215_v63 = vld [vmem:[#allocation2 + $0x560] sm:$0xff] }
  0xfc   :  { %1108 = vmatmul.mubr.f32.gmra.mxu0 %v137_v0  ;;  %v222_v0 = vld [vmem:[#allocation2 + $0x598] sm:$0xff] }
  0xfd   :  { %1113 = vmatprep.mubr.f32.mxu0 %v144_v1 }
  0xfe   :  { %857 = vmatmul.mubr.f32.gmra.mxu1 %v141_v2  ;;  %v219_v2 = vld [vmem:[#allocation2 + $0x580] sm:$0xff] }
  0xff   :  { %862 = vmatprep.mubr.f32.mxu1 %v148_v3  ;;  %v226_v3 = vld [vmem:[#allocation2 + $0x5b8] sm:$0xff] }
 0x100   :  { %1114 = vmatmul.mubr.f32.gmra.mxu0 %v143_v4 }
 0x101   :  { %1119 = vmatprep.mubr.f32.mxu0 %v150_v5  ;;  %v221_v5 = vld [vmem:[#allocation2 + $0x590] sm:$0xff] }
 0x102   :  { %863 = vmatmul.mubr.f32.gmra.mxu1 %v147_v6  ;;  %v228_v6 = vld [vmem:[#allocation2 + $0x5c8] sm:$0xff] }
 0x103   :  { %868 = vmatprep.mubr.f32.mxu1 %v154_v7 }
 0x104   :  { %1120 = vmatmul.mubr.f32.gmra.mxu0 %v149_v8 }
 0x105   :  { %1125 = vmatprep.mubr.f32.mxu0 %v156_v9  ;;  %v225_v9 = vld [vmem:[#allocation2 + $0x5b0] sm:$0xff] }
 0x106   :  { %869 = vmatmul.mubr.f32.gmra.mxu1 %v153_v10  ;;  %v232_v10 = vld [vmem:[#allocation2 + $0x5e8] sm:$0xff] }
 0x107   :  { %874 = vmatprep.mubr.f32.mxu1 %v160_v11 }
 0x108   :  { %1126 = vmatmul.mubr.f32.gmra.mxu0 %v155_v12  ;;  %v227_v12 = vld [vmem:[#allocation2 + $0x5c0] sm:$0xff] }
 0x109   :  { %1131 = vmatprep.mubr.f32.mxu0 %v162_v13  ;;  %v234_v13 = vld [vmem:[#allocation2 + $0x5f8] sm:$0xff] }
 0x10a   :  { %875 = vmatmul.mubr.f32.gmra.mxu1 %v159_v14 }
 0x10b   :  { %880 = vmatprep.mubr.f32.mxu1 %v166_v15  ;;  %v231_v15 = vld [vmem:[#allocation2 + $0x5e0] sm:$0xff] }
 0x10c   :  { %1132 = vmatmul.mubr.f32.gmra.mxu0 %v161_v16 }
 0x10d   :  { %1137 = vmatprep.mubr.f32.mxu0 %v168_v17 }
 0x10e   :  { %881 = vmatmul.mubr.f32.gmra.mxu1 %v165_v18  ;;  %v233_v18 = vld [vmem:[#allocation2 + $0x5f0] sm:$0xff] }
 0x10f   :  { %886 = vmatprep.mubr.f32.mxu1 %v172_v19 }
 0x110   :  { %1138 = vmatmul.mubr.f32.gmra.mxu0 %v167_v20 }
 0x111   :  { %1143 = vmatprep.mubr.f32.mxu0 %v174_v21 }
 0x112   :  { %887 = vmatmul.mubr.f32.gmra.mxu1 %v171_v22 }
 0x113   :  { %892 = vmatprep.mubr.f32.mxu1 %v178_v23 }
 0x114   :  { %1144 = vmatmul.mubr.f32.gmra.mxu0 %v173_v24 }
 0x115   :  { %1149 = vmatprep.mubr.f32.mxu0 %v180_v25 }
 0x116   :  { %893 = vmatmul.mubr.f32.gmra.mxu1 %v177_v26 }
 0x117   :  { %898 = vmatprep.mubr.f32.mxu1 %v184_v27 }
 0x118   :  { %1150 = vmatmul.mubr.f32.gmra.mxu0 %v179_v28 }
 0x119   :  { %1155 = vmatprep.mubr.f32.mxu0 %v186_v29 }
 0x11a   :  { %899 = vmatmul.mubr.f32.gmra.mxu1 %v183_v30 }
 0x11b   :  { %904 = vmatprep.mubr.f32.mxu1 %v190_v31 }
 0x11c   :  { %1156 = vmatmul.mubr.f32.gmra.mxu0 %v185_v32 }
 0x11d   :  { %1161 = vmatprep.mubr.f32.mxu0 %v192_v33 }
 0x11e   :  { %905 = vmatmul.mubr.f32.gmra.mxu1 %v189_v34 }
 0x11f   :  { %910 = vmatprep.mubr.f32.mxu1 %v196_v35  ;;  %v1465_v39 = vpop.f32.mrf.mxu1 }
 0x120   :  { %1162 = vmatmul.mubr.f32.gmra.mxu0 %v191_v36  ;;  %v1467_v41 = vpop.f32.mrf.mxu0 }
 0x121   :  { %1167 = vmatprep.mubr.f32.mxu0 %v198_v37  ;;  %v1469_v43 = vpop.f32.mrf.mxu1 }
 0x122   :  { %911 = vmatmul.mubr.f32.gmra.mxu1 %v195_v38  ;;  %v1471_v45 = vpop.f32.mrf.mxu0 }
 0x123   :  { %916 = vmatprep.mubr.f32.mxu1 %v202_v40 }
 0x124   :  { %1168 = vmatmul.mubr.f32.gmra.mxu0 %v197_v42  ;;  %v1473_v48 = vpop.f32.mrf.mxu1 }
 0x125   :  { %1173 = vmatprep.mubr.f32.mxu0 %v204_v44 }
 0x126   :  { %917 = vmatmul.mubr.f32.gmra.mxu1 %v201_v46  ;;  %v1475_v51 = vpop.f32.mrf.mxu0  ;;  %v1477_v52 = vpop.f32.mrf.mxu1 }
 0x127   :  { %922 = vmatprep.mubr.f32.mxu1 %v208_v47 }
 0x128   :  { %1174 = vmatmul.mubr.f32.gmra.mxu0 %v203_v49  ;;  %v1479_v55 = vpop.f32.mrf.mxu0 }
 0x129   :  { %1179 = vmatprep.mubr.f32.mxu0 %v210_v50 }
 0x12a   :  { %923 = vmatmul.mubr.f32.gmra.mxu1 %v207_v53  ;;  %v1481_v58 = vpop.f32.mrf.mxu1 }
 0x12b   :  { %928 = vmatprep.mubr.f32.mxu1 %v214_v54 }
 0x12c   :  { %1180 = vmatmul.mubr.f32.gmra.mxu0 %v209_v56  ;;  %v1483_v61 = vpop.f32.mrf.mxu0  ;;  %v1485_v62 = vpop.f32.mrf.mxu1 }
 0x12d   :  { %1185 = vmatprep.mubr.f32.mxu0 %v216_v57 }
 0x12e   :  { %929 = vmatmul.mubr.f32.gmra.mxu1 %v213_v59  ;;  %v1487_v1 = vpop.f32.mrf.mxu0 }
 0x12f   :  { %934 = vmatprep.mubr.f32.mxu1 %v220_v60 }
 0x130   :  { %1186 = vmatmul.mubr.f32.gmra.mxu0 %v215_v63  ;;  %v1489_v4 = vpop.f32.mrf.mxu1 }
 0x131   :  { %1191 = vmatprep.mubr.f32.mxu0 %v222_v0 }
 0x132   :  { %935 = vmatmul.mubr.f32.gmra.mxu1 %v219_v2  ;;  %v1491_v7 = vpop.f32.mrf.mxu0  ;;  %v1493_v8 = vpop.f32.mrf.mxu1 }
 0x133   :  { %940 = vmatprep.mubr.f32.mxu1 %v226_v3  ;;  %v429_v3 = vlaneseq }
 0x134   :  { %1192 = vmatmul.mubr.f32.gmra.mxu0 %v221_v5  ;;  %v1495_v11 = vpop.f32.mrf.mxu0 }
 0x135   :  { %1197 = vmatprep.mubr.f32.mxu0 %v228_v6 }
 0x136   :  { %941 = vmatmul.mubr.f32.gmra.mxu1 %v225_v9  ;;  %v1497_v14 = vpop.f32.mrf.mxu1  ;;  %v430_v9 = vshrl.u32 %v429_v3, 7 }
 0x137   :  { %946 = vmatprep.mubr.f32.mxu1 %v232_v10 }
 0x138   :  { %1198 = vmatmul.mubr.f32.gmra.mxu0 %v227_v12  ;;  %v1499_v16 = vpop.f32.mrf.mxu0  ;;  %v1501_v17 = vpop.f32.mrf.mxu1 }
 0x139   :  { %1203 = vmatprep.mubr.f32.mxu0 %v234_v13 }
 0x13a   :  { %947 = vmatmul.mubr.f32.gmra.mxu1 %v231_v15  ;;  %v1503_v19 = vpop.f32.mrf.mxu0  ;;  %v431_v15 = vsub.s32 0, %v430_v9 }
 0x13c   :  { %1204 = vmatmul.mubr.f32.gmra.mxu0 %v233_v18  ;;  %v1505_v20 = vpop.f32.mrf.mxu1  ;;  %v435_v18 = vsub.s32 1, %v430_v9 }
 0x13e   :  { %v1507_v21 = vpop.f32.mrf.mxu0  ;;  %v1509_v22 = vpop.f32.mrf.mxu1 }
 0x140   :  { %v1511_v23 = vpop.f32.mrf.mxu0 }
 0x142   :  { %v1513_v24 = vpop.f32.mrf.mxu1 }
 0x144   :  { %v1515_v25 = vpop.f32.mrf.mxu0  ;;  %v1517_v26 = vpop.f32.mrf.mxu1 }
 0x146   :  { %v1519_v27 = vpop.f32.mrf.mxu0 }
 0x148   :  { %v1521_v28 = vpop.f32.mrf.mxu1 }
 0x149   :  { %1738 = vst [vmem:[#allocation11_spill] sm:$0xff] %v1521_v28 }
 0x14a   :  { %v1523_v29 = vpop.f32.mrf.mxu0  ;;  %v1525_v30 = vpop.f32.mrf.mxu1 }
 0x14b   :  { %1739 = vst [vmem:[#allocation12_spill] sm:$0xff] %v1525_v30 }
 0x14c   :  { %v1527_v31 = vpop.f32.mrf.mxu0 }
 0x14e   :  { %v1529_v32 = vpop.f32.mrf.mxu1 }
 0x14f   :  { %1740 = vst [vmem:[#allocation13_spill] sm:$0xff] %v1529_v32 }
 0x150   :  { %v1531_v33 = vpop.f32.mrf.mxu0  ;;  %v1533_v34 = vpop.f32.mrf.mxu1 }
 0x151   :  { %1741 = vst [vmem:[#allocation14_spill] sm:$0xff] %v1533_v34 }
 0x152   :  { %v1535_v35 = vpop.f32.mrf.mxu0 }
 0x154   :  { %v1537_v36 = vpop.f32.mrf.mxu1 }
 0x155   :  { %1742 = vst [vmem:[#allocation15_spill] sm:$0xff] %v1537_v36 }
 0x156   :  { %v1539_v37 = vpop.f32.mrf.mxu0  ;;  %v1541_v38 = vpop.f32.mrf.mxu1 }
 0x157   :  { %1743 = vst [vmem:[#allocation16_spill] sm:$0xff] %v1541_v38 }
 0x158   :  { %v1543_v40 = vpop.f32.mrf.mxu0 }
 0x15a   :  { %v1545_v42 = vpop.f32.mrf.mxu1 }
 0x15b   :  { %1744 = vst [vmem:[#allocation17_spill] sm:$0xff] %v1545_v42 }
 0x15c   :  { %v1547_v44 = vpop.f32.mrf.mxu0  ;;  %v1549_v46 = vpop.f32.mrf.mxu1 }
 0x15d   :  { %1745 = vst [vmem:[#allocation18_spill] sm:$0xff] %v1549_v46 }
 0x15e   :  { %v1551_v47 = vpop.f32.mrf.mxu0 }
 0x160   :  { %v1553_v49 = vpop.f32.mrf.mxu1 }
 0x161   :  { %1746 = vst [vmem:[#allocation19_spill] sm:$0xff] %v1553_v49 }
 0x162   :  { %v1555_v50 = vpop.f32.mrf.mxu0  ;;  %v1557_v53 = vpop.f32.mrf.mxu1 }
 0x163   :  { %1747 = vst [vmem:[#allocation20_spill] sm:$0xff] %v1557_v53 }
 0x164   :  { %v1559_v54 = vpop.f32.mrf.mxu0 }
 0x166   :  { %v1561_v56 = vpop.f32.mrf.mxu1 }
 0x167   :  { %1748 = vst [vmem:[#allocation21_spill] sm:$0xff] %v1561_v56 }
 0x168   :  { %v1563_v57 = vpop.f32.mrf.mxu0  ;;  %v1565_v59 = vpop.f32.mrf.mxu1 }
 0x169   :  { %1749 = vst [vmem:[#allocation22_spill] sm:$0xff] %v1565_v59 }
 0x16a   :  { %v1567_v60 = vpop.f32.mrf.mxu0 }
 0x16c   :  { %v1569_v63 = vpop.f32.mrf.mxu1 }
 0x16d   :  { %1750 = vst [vmem:[#allocation23_spill] sm:$0xff] %v1569_v63  ;;  %v427_v63 = vld [vmem:[%s1736_s2] sm:$0x3]  ;;  %s1435_s2 = smov [#allocation7]  }
 0x16e   :  { %v1571_v0 = vpop.f32.mrf.mxu0  ;;  %v1573_v2 = vpop.f32.mrf.mxu1  ;;  %v1596_v3 = vrot.slane %v427_v63, %v435_v18  ;;  %s1279_s26 = sshll.u32 %s1435_s2, 4  ;;  %s1280_s26 = int_to_ptr.vmem [resolvable:$true] %s1279_s26 }
 0x16f   :  { %1751 = vst [vmem:[#allocation24_spill] sm:$0xff] %v1573_v2  ;;  %s1403_s27 = scalar_lea.vmem %s1280_s26, 8192  ;;  %p1408_p11 = scmp.lt.s32.totalorder %s1280_s26, %s1280_s26 }
 0x170   :  { %v1575_v5 = vpop.f32.mrf.mxu0  ;;  %v508_v49 = vadd.f32 %v1471_v45, %v1596_v3  ;;  %v514_v18 = vadd.f32 %v1479_v55, %v1596_v3  ;;  %p1404_p10 = scmp.ne.s32.totalorder %s1280_s26, %s1403_s27  ;;  %p1409_p12 = scmp.lt.s32.totalorder %s1403_s27, %s1403_s27 }
 0x172   :  { %v1577_v6 = vpop.f32.mrf.mxu1  ;;  %p1410_p13 = por %p1409_p12, %p1408_p11 }
 0x173   :  { %1752 = vst [vmem:[#allocation25_spill] sm:$0xff] %v1577_v6  ;;  %v1594_v6 = vrot.slane %v427_v63, %v431_v15 }
 0x174   :  { %v1579_v10 = vpop.f32.mrf.mxu0  ;;  %v1581_v12 = vpop.f32.mrf.mxu1  ;;  %p1411_p0 = pnand %p1410_p13, %p1404_p10 }
 0x175   :  { %1753 = vst [vmem:[#allocation26_spill] sm:$0xff] %v1581_v12  ;;  %v506_v12 = vadd.f32 %v1467_v41, %v1594_v6  ;;  %v512_v38 = vadd.f32 %v1475_v51, %v1594_v6  ;;  %v518_v45 = vadd.f32 %v1483_v61, %v1594_v6 }
 0x176   :  { %v1583_v13 = vpop.f32.mrf.mxu0 }
 0x178   :  { %v1588_v59 = vpop.f32.mrf.mxu1 }
 0x179   :  { %1754 = vst [vmem:[#allocation27_spill] sm:$0xff] %v1588_v59 }
 0x17a   :  { %v1590_v2 = vpop.f32.mrf.mxu0  ;;  %v1592_v56 = vpop.f32.mrf.mxu1 }
 0x17b   :  { %1755 = vst [vmem:[#allocation28_spill] sm:$0xff] %v1592_v56 }
 0x17c   :  { %v1598_v53 = vpop.f32.mrf.mxu0 }
 0x17e   :  { %v762_v9 = vpop.f32.mrf.mxu1 }
 0x17f   :  { %v763_v46 = vadd.f32 %v762_v9, %v506_v12 }
 0x180   :  { %v1019_v42 = vpop.f32.mrf.mxu0  ;;  %v764_v59 = vpop.f32.mrf.mxu1 }
 0x181   :  { %v1020_v56 = vadd.f32 %v1019_v42, %v763_v46  ;;  %v765_v15 = vadd.f32 %v764_v59, %v508_v49  ;;  %v520_v42 = vadd.f32 %v1487_v1, %v1596_v3 }
 0x182   :  { %v1021_v36 = vpop.f32.mrf.mxu0  ;;  %v768_v63 = vpop.f32.mrf.mxu1 }
 0x183   :  { %1210 = vst [vmem:[#allocation7] sm:$0xff] %v1020_v56  ;;  %v1022_v34 = vadd.f32 %v1021_v36, %v765_v15  ;;  %v769_v41 = vadd.f32 %v768_v63, %v512_v38  ;;  %v524_v36 = vadd.f32 %v1491_v7, %v1594_v6 }
 0x184   :  { %v1025_v32 = vpop.f32.mrf.mxu0  ;;  %v770_v30 = vpop.f32.mrf.mxu1 }
 0x185   :  { %1211 = vst [vmem:[#allocation7 + $0x8] sm:$0xff] %v1022_v34  ;;  %v1026_v12 = vadd.f32 %v1025_v32, %v769_v41  ;;  %v771_v9 = vadd.f32 %v770_v30, %v514_v18  ;;  %v526_v30 = vadd.f32 %v1495_v11, %v1596_v3 }
 0x186   :  { %v1027_v28 = vpop.f32.mrf.mxu0  ;;  %v774_v51 = vpop.f32.mrf.mxu1 }
 0x187   :  { %1212 = vst [vmem:[#allocation7 + $0x10] sm:$0xff] %v1026_v12  ;;  %v1028_v46 = vadd.f32 %v1027_v28, %v771_v9  ;;  %v775_v49 = vadd.f32 %v774_v51, %v518_v45  ;;  %v530_v28 = vadd.f32 %v1499_v16, %v1594_v6  ;;  %v532_v12 = vadd.f32 %v1503_v19, %v1596_v3 }
 0x188   :  { %v1031_v55 = vpop.f32.mrf.mxu0  ;;  %v776_v56 = vpop.f32.mrf.mxu1 }
 0x189   :  { %1213 = vst [vmem:[#allocation7 + $0x18] sm:$0xff] %v1028_v46  ;;  %v1032_v38 = vadd.f32 %v1031_v55, %v775_v49  ;;  %v777_v59 = vadd.f32 %v776_v56, %v520_v42  ;;  %v536_v46 = vadd.f32 %v1507_v21, %v1594_v6 }
 0x18a   :  { %v1033_v61 = vpop.f32.mrf.mxu0  ;;  %v780_v34 = vpop.f32.mrf.mxu1 }
 0x18b   :  { %1214 = vst [vmem:[#allocation7 + $0x20] sm:$0xff] %v1032_v38  ;;  %v1034_v32 = vadd.f32 %v1033_v61, %v777_v59  ;;  %v781_v15 = vadd.f32 %v780_v34, %v524_v36  ;;  %v538_v36 = vadd.f32 %v1511_v23, %v1596_v3  ;;  %v542_v34 = vadd.f32 %v1515_v25, %v1594_v6 }
 0x18c   :  { %v1037_v1 = vpop.f32.mrf.mxu0  ;;  %v782_v63 = vpop.f32.mrf.mxu1 }
 0x18d   :  { %1215 = vst [vmem:[#allocation7 + $0x28] sm:$0xff] %v1034_v32  ;;  %v1038_v18 = vadd.f32 %v1037_v1, %v781_v15  ;;  %v783_v41 = vadd.f32 %v782_v63, %v526_v30  ;;  %v544_v1 = vadd.f32 %v1519_v27, %v1596_v3 }
 0x18e   :  { %v1039_v7 = vpop.f32.mrf.mxu0  ;;  %v786_v45 = vpop.f32.mrf.mxu1 }
 0x18f   :  { %1216 = vst [vmem:[#allocation7 + $0x30] sm:$0xff] %v1038_v18  ;;  %v1040_v9 = vadd.f32 %v1039_v7, %v783_v41  ;;  %v787_v51 = vadd.f32 %v786_v45, %v530_v28  ;;  %v548_v41 = vadd.f32 %v1523_v29, %v1594_v6 }
 0x190   :  { %v1043_v11 = vpop.f32.mrf.mxu0  ;;  %v788_v42 = vpop.f32.mrf.mxu1 }
 0x191   :  { %1217 = vst [vmem:[#allocation7 + $0x38] sm:$0xff] %v1040_v9  ;;  %v1044_v49 = vadd.f32 %v1043_v11, %v787_v51  ;;  %v789_v55 = vadd.f32 %v788_v42, %v532_v12  ;;  %v550_v9 = vadd.f32 %v1527_v31, %v1596_v3 }
 0x192   :  { %v1045_v16 = vpop.f32.mrf.mxu0  ;;  %v792_v56 = vpop.f32.mrf.mxu1 }
 0x193   :  { %1218 = vst [vmem:[#allocation7 + $0x40] sm:$0xff] %v1044_v49  ;;  %v1046_v38 = vadd.f32 %v1045_v16, %v789_v55  ;;  %v793_v59 = vadd.f32 %v792_v56, %v536_v46  ;;  %v554_v46 = vadd.f32 %v1531_v33, %v1594_v6  ;;  %v556_v56 = vadd.f32 %v1535_v35, %v1596_v3 }
 0x194   :  { %v1049_v19 = vpop.f32.mrf.mxu0  ;;  %v794_v61 = vpop.f32.mrf.mxu1 }
 0x195   :  { %1219 = vst [vmem:[#allocation7 + $0x48] sm:$0xff] %v1046_v38  ;;  %v1050_v30 = vadd.f32 %v1049_v19, %v793_v59  ;;  %v795_v32 = vadd.f32 %v794_v61, %v538_v36  ;;  %v560_v19 = vadd.f32 %v1539_v37, %v1594_v6 }
 0x196   :  { %v1051_v21 = vpop.f32.mrf.mxu0  ;;  %v798_v15 = vpop.f32.mrf.mxu1 }
 0x197   :  { %1220 = vst [vmem:[#allocation7 + $0x50] sm:$0xff] %v1050_v30  ;;  %v1052_v63 = vadd.f32 %v1051_v21, %v795_v32  ;;  %v799_v28 = vadd.f32 %v798_v15, %v542_v34  ;;  %v562_v32 = vadd.f32 %v1543_v40, %v1596_v3 }
 0x198   :  { %v1055_v23 = vpop.f32.mrf.mxu0  ;;  %v800_v18 = vpop.f32.mrf.mxu1 }
 0x199   :  { %1221 = vst [vmem:[#allocation7 + $0x58] sm:$0xff] %v1052_v63  ;;  %v1056_v7 = vadd.f32 %v1055_v23, %v799_v28  ;;  %v801_v45 = vadd.f32 %v800_v18, %v544_v1  ;;  %v566_v63 = vadd.f32 %v1547_v44, %v1594_v6 }
 0x19a   :  { %v1057_v25 = vpop.f32.mrf.mxu0  ;;  %v804_v12 = vpop.f32.mrf.mxu1 }
 0x19b   :  { %1222 = vst [vmem:[#allocation7 + $0x60] sm:$0xff] %v1056_v7  ;;  %v1058_v51 = vadd.f32 %v1057_v25, %v801_v45  ;;  %v805_v11 = vadd.f32 %v804_v12, %v548_v41  ;;  %v568_v41 = vadd.f32 %v1551_v47, %v1596_v3  ;;  %v572_v12 = vadd.f32 %v1555_v50, %v1594_v6 }
 0x19c   :  { %v1061_v27 = vpop.f32.mrf.mxu0  ;;  %v806_v42 = vpop.f32.mrf.mxu1 }
 0x19d   :  { %1223 = vst [vmem:[#allocation7 + $0x68] sm:$0xff] %v1058_v51  ;;  %v1062_v49 = vadd.f32 %v1061_v27, %v805_v11  ;;  %v807_v55 = vadd.f32 %v806_v42, %v550_v9  ;;  %v574_v27 = vadd.f32 %v1559_v54, %v1596_v3 }
 0x19e   :  { %v1063_v29 = vpop.f32.mrf.mxu0  ;;  %v810_v16 = vpop.f32.mrf.mxu1 }
 0x19f   :  { %1224 = vst [vmem:[#allocation7 + $0x70] sm:$0xff] %v1062_v49  ;;  %v1064_v36 = vadd.f32 %v1063_v29, %v807_v55  ;;  %v811_v38 = vadd.f32 %v810_v16, %v554_v46  ;;  %v578_v55 = vadd.f32 %v1563_v57, %v1594_v6 }
 0x1a0   :  { %v1067_v31 = vpop.f32.mrf.mxu0  ;;  %v812_v59 = vpop.f32.mrf.mxu1 }
 0x1a1   :  { %1225 = vst [vmem:[#allocation7 + $0x78] sm:$0xff] %v1064_v36  ;;  %v1068_v61 = vadd.f32 %v1067_v31, %v811_v38  ;;  %v813_v34 = vadd.f32 %v812_v59, %v556_v56  ;;  %v580_v36 = vadd.f32 %v1567_v60, %v1596_v3 }
 0x1a2   :  { %v1069_v33 = vpop.f32.mrf.mxu0  ;;  %v816_v30 = vpop.f32.mrf.mxu1 }
 0x1a3   :  { %1226 = vst [vmem:[#allocation7 + $0x80] sm:$0xff] %v1068_v61  ;;  %v1070_v21 = vadd.f32 %v1069_v33, %v813_v34  ;;  %v817_v15 = vadd.f32 %v816_v30, %v560_v19  ;;  %v584_v19 = vadd.f32 %v1571_v0, %v1594_v6  ;;  %v586_v30 = vadd.f32 %v1575_v5, %v1596_v3 }
 0x1a4   :  { %v1073_v35 = vpop.f32.mrf.mxu0  ;;  %v818_v1 = vpop.f32.mrf.mxu1 }
 0x1a5   :  { %1227 = vst [vmem:[#allocation7 + $0x88] sm:$0xff] %v1070_v21  ;;  %v1074_v28 = vadd.f32 %v1073_v35, %v817_v15  ;;  %v819_v23 = vadd.f32 %v818_v1, %v562_v32  ;;  %v590_v35 = vadd.f32 %v1579_v10, %v1594_v6 }
 0x1a6   :  { %v1075_v37 = vpop.f32.mrf.mxu0  ;;  %v822_v18 = vpop.f32.mrf.mxu1 }
 0x1a7   :  { %1228 = vst [vmem:[#allocation7 + $0x90] sm:$0xff] %v1074_v28  ;;  %v1076_v7 = vadd.f32 %v1075_v37, %v819_v23  ;;  %v823_v45 = vadd.f32 %v822_v18, %v566_v63  ;;  %v592_v23 = vadd.f32 %v1583_v13, %v1596_v3 }
 0x1a8   :  { %v1079_v40 = vpop.f32.mrf.mxu0  ;;  %v824_v25 = vpop.f32.mrf.mxu1 }
 0x1a9   :  { %1229 = vst [vmem:[#allocation7 + $0x98] sm:$0xff] %v1076_v7  ;;  %v1080_v9 = vadd.f32 %v1079_v40, %v823_v45  ;;  %v825_v51 = vadd.f32 %v824_v25, %v568_v41  ;;  %v596_v7 = vadd.f32 %v1590_v2, %v1594_v6 }
 0x1aa   :  { %v1081_v44 = vpop.f32.mrf.mxu0  ;;  %v828_v11 = vpop.f32.mrf.mxu1 }
 0x1ab   :  { %1230 = vst [vmem:[#allocation7 + $0xa0] sm:$0xff] %v1080_v9  ;;  %v1082_v42 = vadd.f32 %v1081_v44, %v825_v51  ;;  %v829_v46 = vadd.f32 %v828_v11, %v572_v12  ;;  %v598_v12 = vadd.f32 %v1598_v53, %v1596_v3  ;;  %v602_v11 = vadd.f32 %v1465_v39, %v1594_v6 }
 0x1ac   :  { %v1085_v47 = vpop.f32.mrf.mxu0  ;;  %v830_v49 = vpop.f32.mrf.mxu1 }
 0x1ad   :  { %1231 = vst [vmem:[#allocation7 + $0xa8] sm:$0xff] %v1082_v42  ;;  %v1086_v29 = vadd.f32 %v1085_v47, %v829_v46  ;;  %v831_v16 = vadd.f32 %v830_v49, %v574_v27  ;;  %v604_v47 = vadd.f32 %v1469_v43, %v1596_v3 }
 0x1ae   :  { %v1087_v50 = vpop.f32.mrf.mxu0  ;;  %v834_v56 = vpop.f32.mrf.mxu1 }
 0x1af   :  { %1232 = vst [vmem:[#allocation7 + $0xb0] sm:$0xff] %v1086_v29  ;;  %v1088_v38 = vadd.f32 %v1087_v50, %v831_v16  ;;  %v835_v31 = vadd.f32 %v834_v56, %v578_v55  ;;  %v608_v16 = vadd.f32 %v1473_v48, %v1594_v6 }
 0x1b0   :  { %v1091_v54 = vpop.f32.mrf.mxu0  ;;  %v836_v59 = vpop.f32.mrf.mxu1 }
 0x1b1   :  { %1233 = vst [vmem:[#allocation7 + $0xb8] sm:$0xff] %v1088_v38  ;;  %v1092_v61 = vadd.f32 %v1091_v54, %v835_v31  ;;  %v837_v34 = vadd.f32 %v836_v59, %v580_v36  ;;  %v610_v38 = vadd.f32 %v1477_v52, %v1596_v3 }
 0x1b2   :  { %v1093_v57 = vpop.f32.mrf.mxu0  ;;  %v840_v33 = vpop.f32.mrf.mxu1 }
 0x1b3   :  { %1234 = vst [vmem:[#allocation7 + $0xc0] sm:$0xff] %v1092_v61  ;;  %v1094_v32 = vadd.f32 %v1093_v57, %v837_v34  ;;  %v841_v21 = vadd.f32 %v840_v33, %v584_v19  ;;  %v614_v19 = vadd.f32 %v1481_v58, %v1594_v6  ;;  %v616_v33 = vadd.f32 %v1485_v62, %v1596_v3 }
 0x1b4   :  { %v1097_v60 = vpop.f32.mrf.mxu0  ;;  %v842_v15 = vpop.f32.mrf.mxu1 }
 0x1b5   :  { %1235 = vst [vmem:[#allocation7 + $0xc8] sm:$0xff] %v1094_v32  ;;  %v1098_v1 = vadd.f32 %v1097_v60, %v841_v21  ;;  %v843_v63 = vadd.f32 %v842_v15, %v586_v30  ;;  %v620_v60 = vadd.f32 %v1489_v4, %v1594_v6 }
 0x1b6   :  { %v1099_v0 = vpop.f32.mrf.mxu0  ;;  %v846_v28 = vpop.f32.mrf.mxu1 }
 0x1b7   :  { %1236 = vst [vmem:[#allocation7 + $0xd0] sm:$0xff] %v1098_v1  ;;  %v1100_v37 = vadd.f32 %v1099_v0, %v843_v63  ;;  %v847_v18 = vadd.f32 %v846_v28, %v590_v35  ;;  %v622_v63 = vadd.f32 %v1493_v8, %v1596_v3 }
 0x1b8   :  { %v1103_v5 = vpop.f32.mrf.mxu0  ;;  %v848_v41 = vpop.f32.mrf.mxu1 }
 0x1b9   :  { %1237 = vst [vmem:[#allocation7 + $0xd8] sm:$0xff] %v1100_v37  ;;  %v1104_v45 = vadd.f32 %v1103_v5, %v847_v18  ;;  %v849_v40 = vadd.f32 %v848_v41, %v592_v23  ;;  %v626_v37 = vadd.f32 %v1497_v14, %v1594_v6 }
 0x1ba   :  { %v1105_v10 = vpop.f32.mrf.mxu0  ;;  %v852_v25 = vpop.f32.mrf.mxu1 }
 0x1bb   :  { %1238 = vst [vmem:[#allocation7 + $0xe0] sm:$0xff] %v1104_v45  ;;  %v1106_v9 = vadd.f32 %v1105_v10, %v849_v40  ;;  %v853_v51 = vadd.f32 %v852_v25, %v596_v7  ;;  %v628_v7 = vadd.f32 %v1501_v17, %v1596_v3  ;;  %v632_v25 = vadd.f32 %v1505_v20, %v1594_v6 }
 0x1bc   :  { %v1109_v13 = vpop.f32.mrf.mxu0  ;;  %v854_v44 = vpop.f32.mrf.mxu1 }
 0x1bd   :  { %1239 = vst [vmem:[#allocation7 + $0xe8] sm:$0xff] %v1106_v9  ;;  %v1110_v27 = vadd.f32 %v1109_v13, %v853_v51  ;;  %v855_v42 = vadd.f32 %v854_v44, %v598_v12  ;;  %v634_v13 = vadd.f32 %v1509_v22, %v1596_v3 }
 0x1be   :  { %v1111_v2 = vpop.f32.mrf.mxu0  ;;  %v858_v46 = vpop.f32.mrf.mxu1 }
 0x1bf   :  { %1240 = vst [vmem:[#allocation7 + $0xf0] sm:$0xff] %v1110_v27  ;;  %v1112_v49 = vadd.f32 %v1111_v2, %v855_v42  ;;  %v859_v55 = vadd.f32 %v858_v46, %v602_v11  ;;  %v638_v42 = vadd.f32 %v1513_v24, %v1594_v6 }
 0x1c0   :  { %v1115_v53 = vpop.f32.mrf.mxu0  ;;  %v860_v29 = vpop.f32.mrf.mxu1 }
 0x1c1   :  { %1241 = vst [vmem:[#allocation7 + $0xf8] sm:$0xff] %v1112_v49  ;;  %v1116_v50 = vadd.f32 %v1115_v53, %v859_v55  ;;  %v861_v56 = vadd.f32 %v860_v29, %v604_v47  ;;  %v640_v49 = vadd.f32 %v1517_v26, %v1596_v3 }
 0x1c2   :  { %v1117_v39 = vpop.f32.mrf.mxu0  ;;  %v864_v36 = vpop.f32.mrf.mxu1 }
 0x1c3   :  { %1242 = vst [vmem:[#allocation7 + $0x100] sm:$0xff] %v1116_v50  ;;  %v1118_v31 = vadd.f32 %v1117_v39, %v861_v56  ;;  %v865_v54 = vadd.f32 %v864_v36, %v608_v16  ;;  %v1756_v16 = vld [vmem:[#allocation11_spill] sm:$0xff] }
 0x1c4   :  { %v1121_v43 = vpop.f32.mrf.mxu0  ;;  %v866_v59 = vpop.f32.mrf.mxu1  ;;  %v644_v50 = vadd.f32 %v1756_v16, %v1594_v6 }
 0x1c5   :  { %1243 = vst [vmem:[#allocation7 + $0x108] sm:$0xff] %v1118_v31  ;;  %v1122_v61 = vadd.f32 %v1121_v43, %v865_v54  ;;  %v867_v34 = vadd.f32 %v866_v59, %v610_v38  ;;  %v1757_v38 = vld [vmem:[#allocation12_spill] sm:$0xff] }
 0x1c6   :  { %v1123_v48 = vpop.f32.mrf.mxu0  ;;  %v870_v57 = vpop.f32.mrf.mxu1  ;;  %v646_v31 = vadd.f32 %v1757_v38, %v1596_v3 }
 0x1c7   :  { %1244 = vst [vmem:[#allocation7 + $0x110] sm:$0xff] %v1122_v61  ;;  %v1124_v30 = vadd.f32 %v1123_v48, %v867_v34  ;;  %v871_v32 = vadd.f32 %v870_v57, %v614_v19  ;;  %v1758_v19 = vld [vmem:[#allocation13_spill] sm:$0xff] }
 0x1c8   :  { %v1127_v52 = vpop.f32.mrf.mxu0  ;;  %v872_v21 = vpop.f32.mrf.mxu1  ;;  %v650_v61 = vadd.f32 %v1758_v19, %v1594_v6 }
 0x1c9   :  { %1245 = vst [vmem:[#allocation7 + $0x118] sm:$0xff] %v1124_v30  ;;  %v1128_v15 = vadd.f32 %v1127_v52, %v871_v32  ;;  %v873_v35 = vadd.f32 %v872_v21, %v616_v33  ;;  %v1759_v30 = vld [vmem:[#allocation14_spill] sm:$0xff] }
 0x1ca   :  { %v1129_v58 = vpop.f32.mrf.mxu0  ;;  %v876_v1 = vpop.f32.mrf.mxu1  ;;  %v652_v32 = vadd.f32 %v1759_v30, %v1596_v3 }
 0x1cb   :  { %1246 = vst [vmem:[#allocation7 + $0x120] sm:$0xff] %v1128_v15  ;;  %v1130_v0 = vadd.f32 %v1129_v58, %v873_v35  ;;  %v877_v28 = vadd.f32 %v876_v1, %v620_v60  ;;  %v1760_v35 = vld [vmem:[#allocation15_spill] sm:$0xff] }
 0x1cc   :  { %v1133_v62 = vpop.f32.mrf.mxu0  ;;  %v878_v23 = vpop.f32.mrf.mxu1  ;;  %v656_v58 = vadd.f32 %v1760_v35, %v1594_v6 }
 0x1cd   :  { %1247 = vst [vmem:[#allocation7 + $0x128] sm:$0xff] %v1130_v0  ;;  %v1134_v18 = vadd.f32 %v1133_v62, %v877_v28  ;;  %v879_v5 = vadd.f32 %v878_v23, %v622_v63  ;;  %v1761_v62 = vld [vmem:[#allocation16_spill] sm:$0xff] }
 0x1ce   :  { %v1135_v4 = vpop.f32.mrf.mxu0  ;;  %v882_v41 = vpop.f32.mrf.mxu1  ;;  %v658_v23 = vadd.f32 %v1761_v62, %v1596_v3 }
 0x1cf   :  { %1248 = vst [vmem:[#allocation7 + $0x130] sm:$0xff] %v1134_v18  ;;  %v1136_v45 = vadd.f32 %v1135_v4, %v879_v5  ;;  %v883_v40 = vadd.f32 %v882_v41, %v626_v37  ;;  %v1762_v41 = vld [vmem:[#allocation17_spill] sm:$0xff] }
 0x1d0   :  { %v1139_v8 = vpop.f32.mrf.mxu0  ;;  %v884_v10 = vpop.f32.mrf.mxu1 }
 0x1d1   :  { %1249 = vst [vmem:[#allocation7 + $0x138] sm:$0xff] %v1136_v45  ;;  %v1140_v12 = vadd.f32 %v1139_v8, %v883_v40  ;;  %v885_v9 = vadd.f32 %v884_v10, %v628_v7  ;;  %v662_v7 = vadd.f32 %v1762_v41, %v1594_v6 }
 0x1d2   :  { %v1141_v14 = vpop.f32.mrf.mxu0  ;;  %v888_v51 = vpop.f32.mrf.mxu1 }
 0x1d3   :  { %1250 = vst [vmem:[#allocation7 + $0x140] sm:$0xff] %v1140_v12  ;;  %v1142_v44 = vadd.f32 %v1141_v14, %v885_v9  ;;  %v889_v11 = vadd.f32 %v888_v51, %v632_v25  ;;  %v1763_v25 = vld [vmem:[#allocation18_spill] sm:$0xff] }
 0x1d4   :  { %v1145_v17 = vpop.f32.mrf.mxu0  ;;  %v890_v27 = vpop.f32.mrf.mxu1  ;;  %v664_v12 = vadd.f32 %v1763_v25, %v1596_v3 }
 0x1d5   :  { %1251 = vst [vmem:[#allocation7 + $0x148] sm:$0xff] %v1142_v44  ;;  %v1146_v2 = vadd.f32 %v1145_v17, %v889_v11  ;;  %v891_v46 = vadd.f32 %v890_v27, %v634_v13  ;;  %v1764_v44 = vld [vmem:[#allocation19_spill] sm:$0xff] }
 0x1d6   :  { %v1147_v20 = vpop.f32.mrf.mxu0  ;;  %v894_v47 = vpop.f32.mrf.mxu1  ;;  %v668_v11 = vadd.f32 %v1764_v44, %v1594_v6 }
 0x1d7   :  { %1252 = vst [vmem:[#allocation7 + $0x150] sm:$0xff] %v1146_v2  ;;  %v1148_v55 = vadd.f32 %v1147_v20, %v891_v46  ;;  %v895_v53 = vadd.f32 %v894_v47, %v638_v42  ;;  %v1765_v46 = vld [vmem:[#allocation20_spill] sm:$0xff] }
 0x1d8   :  { %v1151_v22 = vpop.f32.mrf.mxu0  ;;  %v896_v29 = vpop.f32.mrf.mxu1  ;;  %v670_v20 = vadd.f32 %v1765_v46, %v1596_v3 }
 0x1d9   :  { %1253 = vst [vmem:[#allocation7 + $0x158] sm:$0xff] %v1148_v55  ;;  %v1152_v56 = vadd.f32 %v1151_v22, %v895_v53  ;;  %v897_v39 = vadd.f32 %v896_v29, %v640_v49  ;;  %v1766_v22 = vld [vmem:[#allocation21_spill] sm:$0xff] }
 0x1da   :  { %v1153_v24 = vpop.f32.mrf.mxu0  ;;  %v900_v36 = vpop.f32.mrf.mxu1  ;;  %v674_v29 = vadd.f32 %v1766_v22, %v1594_v6 }
 0x1db   :  { %1254 = vst [vmem:[#allocation7 + $0x160] sm:$0xff] %v1152_v56  ;;  %v1154_v54 = vadd.f32 %v1153_v24, %v897_v39  ;;  %v901_v43 = vadd.f32 %v900_v36, %v644_v50  ;;  %v1767_v24 = vld [vmem:[#allocation22_spill] sm:$0xff] }
 0x1dc   :  { %v1157_v26 = vpop.f32.mrf.mxu0  ;;  %v902_v59 = vpop.f32.mrf.mxu1  ;;  %v676_v36 = vadd.f32 %v1767_v24, %v1596_v3 }
 0x1dd   :  { %1255 = vst [vmem:[#allocation7 + $0x168] sm:$0xff] %v1154_v54  ;;  %v1158_v34 = vadd.f32 %v1157_v26, %v901_v43  ;;  %v903_v48 = vadd.f32 %v902_v59, %v646_v31  ;;  %v1768_v26 = vld [vmem:[#allocation23_spill] sm:$0xff] }
 0x1de   :  { %v1159_v57 = vpop.f32.mrf.mxu0  ;;  %v906_v33 = vpop.f32.mrf.mxu1  ;;  %v680_v59 = vadd.f32 %v1768_v26, %v1594_v6 }
 0x1df   :  { %1256 = vst [vmem:[#allocation7 + $0x170] sm:$0xff] %v1158_v34  ;;  %v1160_v52 = vadd.f32 %v1159_v57, %v903_v48  ;;  %v907_v21 = vadd.f32 %v906_v33, %v650_v61  ;;  %v1769_v57 = vld [vmem:[#allocation24_spill] sm:$0xff] }
 0x1e0   :  { %v1163_v60 = vpop.f32.mrf.mxu0  ;;  %v908_v15 = vpop.f32.mrf.mxu1  ;;  %v682_v33 = vadd.f32 %v1769_v57, %v1596_v3 }
 0x1e1   :  { %1257 = vst [vmem:[#allocation7 + $0x178] sm:$0xff] %v1160_v52  ;;  %v1164_v1 = vadd.f32 %v1163_v60, %v907_v21  ;;  %v909_v63 = vadd.f32 %v908_v15, %v652_v32  ;;  %v1770_v60 = vld [vmem:[#allocation25_spill] sm:$0xff] }
 0x1e2   :  { %v1165_v0 = vpop.f32.mrf.mxu0  ;;  %v912_v28 = vpop.f32.mrf.mxu1  ;;  %v686_v15 = vadd.f32 %v1770_v60, %v1594_v6 }
 0x1e3   :  { %1258 = vst [vmem:[#allocation7 + $0x180] sm:$0xff] %v1164_v1  ;;  %v1166_v37 = vadd.f32 %v1165_v0, %v909_v63  ;;  %v913_v18 = vadd.f32 %v912_v28, %v656_v58  ;;  %v1771_v0 = vld [vmem:[#allocation26_spill] sm:$0xff] }
 0x1e4   :  { %v1169_v5 = vpop.f32.mrf.mxu0  ;;  %v914_v4 = vpop.f32.mrf.mxu1  ;;  %v688_v28 = vadd.f32 %v1771_v0, %v1596_v3 }
 0x1e5   :  { %1259 = vst [vmem:[#allocation7 + $0x188] sm:$0xff] %v1166_v37  ;;  %v1170_v45 = vadd.f32 %v1169_v5, %v913_v18  ;;  %v915_v40 = vadd.f32 %v914_v4, %v658_v23  ;;  %v1772_v5 = vld [vmem:[#allocation27_spill] sm:$0xff] }
 0x1e6   :  { %v1171_v8 = vpop.f32.mrf.mxu0  ;;  %v918_v10 = vpop.f32.mrf.mxu1  ;;  %v692_v4 = vadd.f32 %v1772_v5, %v1594_v6 }
 0x1e7   :  { %1260 = vst [vmem:[#allocation7 + $0x190] sm:$0xff] %v1170_v45  ;;  %v1172_v9 = vadd.f32 %v1171_v8, %v915_v40  ;;  %v919_v14 = vadd.f32 %v918_v10, %v662_v7  ;;  %v1773_v8 = vld [vmem:[#allocation28_spill] sm:$0xff] }
 0x1e8   :  { %v1175_v51 = vpop.f32.mrf.mxu0  ;;  %v920_v13 = vpop.f32.mrf.mxu1  ;;  %v694_v10 = vadd.f32 %v1773_v8, %v1596_v3 }
 0x1e9   :  { %1261 = vst [vmem:[#allocation7 + $0x198] sm:$0xff] %v1172_v9  ;;  %v1176_v17 = vadd.f32 %v1175_v51, %v919_v14  ;;  %v921_v27 = vadd.f32 %v920_v13, %v664_v12 }
 0x1ea   :  { %v1177_v42 = vpop.f32.mrf.mxu0  ;;  %v924_v2 = vpop.f32.mrf.mxu1 }
 0x1eb   :  { %1262 = vst [vmem:[#allocation7 + $0x1a0] sm:$0xff] %v1176_v17  ;;  %v1178_v47 = vadd.f32 %v1177_v42, %v921_v27  ;;  %v925_v49 = vadd.f32 %v924_v2, %v668_v11 }
 0x1ec   :  { %v1181_v55 = vpop.f32.mrf.mxu0  ;;  %v926_v53 = vpop.f32.mrf.mxu1 }
 0x1ed   :  { %1263 = vst [vmem:[#allocation7 + $0x1a8] sm:$0xff] %v1178_v47  ;;  %v1182_v16 = vadd.f32 %v1181_v55, %v925_v49  ;;  %v927_v50 = vadd.f32 %v926_v53, %v670_v20 }
 0x1ee   :  { %v1183_v56 = vpop.f32.mrf.mxu0  ;;  %v930_v39 = vpop.f32.mrf.mxu1 }
 0x1ef   :  { %1264 = vst [vmem:[#allocation7 + $0x1b0] sm:$0xff] %v1182_v16  ;;  %v1184_v38 = vadd.f32 %v1183_v56, %v927_v50  ;;  %v931_v31 = vadd.f32 %v930_v39, %v674_v29 }
 0x1f0   :  { %v1187_v54 = vpop.f32.mrf.mxu0  ;;  %v932_v43 = vpop.f32.mrf.mxu1 }
 0x1f1   :  { %1265 = vst [vmem:[#allocation7 + $0x1b8] sm:$0xff] %v1184_v38  ;;  %v1188_v19 = vadd.f32 %v1187_v54, %v931_v31  ;;  %v933_v61 = vadd.f32 %v932_v43, %v676_v36 }
 0x1f2   :  { %v1189_v34 = vpop.f32.mrf.mxu0  ;;  %v936_v48 = vpop.f32.mrf.mxu1 }
 0x1f3   :  { %1266 = vst [vmem:[#allocation7 + $0x1c0] sm:$0xff] %v1188_v19  ;;  %v1190_v30 = vadd.f32 %v1189_v34, %v933_v61  ;;  %v937_v32 = vadd.f32 %v936_v48, %v680_v59 }
 0x1f4   :  { %v1193_v52 = vpop.f32.mrf.mxu0  ;;  %v938_v21 = vpop.f32.mrf.mxu1 }
 0x1f5   :  { %1267 = vst [vmem:[#allocation7 + $0x1c8] sm:$0xff] %v1190_v30  ;;  %v1194_v35 = vadd.f32 %v1193_v52, %v937_v32  ;;  %v939_v58 = vadd.f32 %v938_v21, %v682_v33 }
 0x1f6   :  { %v1195_v1 = vpop.f32.mrf.mxu0  ;;  %v942_v63 = vpop.f32.mrf.mxu1 }
 0x1f7   :  { %1268 = vst [vmem:[#allocation7 + $0x1d0] sm:$0xff] %v1194_v35  ;;  %v1196_v62 = vadd.f32 %v1195_v1, %v939_v58  ;;  %v943_v23 = vadd.f32 %v942_v63, %v686_v15 }
 0x1f8   :  { %v1199_v37 = vpop.f32.mrf.mxu0  ;;  %v944_v18 = vpop.f32.mrf.mxu1 }
 0x1f9   :  { %1269 = vst [vmem:[#allocation7 + $0x1d8] sm:$0xff] %v1196_v62  ;;  %v1200_v41 = vadd.f32 %v1199_v37, %v943_v23  ;;  %v945_v7 = vadd.f32 %v944_v18, %v688_v28 }
 0x1fa   :  { %v1201_v45 = vpop.f32.mrf.mxu0  ;;  %v948_v40 = vpop.f32.mrf.mxu1 }
 0x1fb   :  { %1270 = vst [vmem:[#allocation7 + $0x1e0] sm:$0xff] %v1200_v41  ;;  %v1202_v25 = vadd.f32 %v1201_v45, %v945_v7  ;;  %v949_v12 = vadd.f32 %v948_v40, %v692_v4 }
 0x1fc   :  { %v1205_v9 = vpop.f32.mrf.mxu0  ;;  %v950_v14 = vpop.f32.mrf.mxu1 }
 0x1fd   :  { %1271 = vst [vmem:[#allocation7 + $0x1e8] sm:$0xff] %v1202_v25  ;;  %v1206_v51 = vadd.f32 %v1205_v9, %v949_v12  ;;  %v951_v13 = vadd.f32 %v950_v14, %v694_v10 }
 0x1fe   :  { %v1207_v44 = vpop.f32.mrf.mxu0 }
 0x1ff   :  { %1272 = vst [vmem:[#allocation7 + $0x1f0] sm:$0xff] %v1206_v51  ;;  %v1208_v6 = vadd.f32 %v1207_v44, %v951_v13 }
 0x201   :  { %1273 = vst [vmem:[#allocation7 + $0x1f8] sm:$0xff] %v1208_v6 }
 0x202   :  { %1414 = shalt.err (!%p1411_p0)
}
 0x203   :  { %1285 = dma.vmem_to_hbm [thread:$0]  %s1280_s26, 8192, %s1737_s3, [#allocation4], %s1433_s22, %s1433_s22, %s1434_s23  }
 0x204   :  { %1427 = dma.done.wait [#allocation4], 8192  }
 0x205   :  { %1428 = vsyncadd [#allocation4], 4294959104 }
 0x206   :  { %1289 = vsyncpa [#allocation3], 1 }
 0x207   :  { %1290 = vsyncpa [#allocation6], 1 }
 0x208   :  { %1291 = vsyncpa [#allocation4], 1 }

</bundles_post_ra>
